<compile_context>
chip_gen: v5e
topology: v5e:2x2
jax: 0.10.0
libtpu: 0.0.40
codegen_flags: <defaults>
</compile_context>

<pallas_src>
import jax
import jax.numpy as jnp
from jax.experimental import pallas as pl
from jax.experimental.pallas import tpu as pltpu


H1 = 400      # true per-tower layer-1 width
H1P = 512     # padded layer-1 width (lane-aligned split at 512)
H2 = 300      # true layer-2 width
H2P = 384     # padded layer-2 width = 3 * 128 (unmasked stores)
QP = 128      # padded fused-head width (q1 = col 0, q2 = col 1)


# ----------------------------------------------------------------------------- kernel
def critic_kernel(xu_ref,
                  w14_ref, b14_ref,
                  w2_ref, b2_ref, w5_ref, b5_ref,
                  w3c_ref, w6c_ref, b36_ref,
                  q12_ref, x11_ref, x22_ref):
    bf16 = jnp.bfloat16
    xu = xu_ref[...].astype(bf16)

    # ---- layer 1, both towers fused: (TM, 1024); cols [400:512] & [912:1024] are 0 ----
    h12 = jnp.maximum(
        jnp.dot(xu, w14_ref[...], preferred_element_type=jnp.float32) + b14_ref[...],
        0.0)
    h1 = h12[:, :H1P].astype(bf16)   # lane-aligned (starts at 0)
    h2 = h12[:, H1P:].astype(bf16)   # lane-aligned (starts at 512)

    # ---- layer 2: (512, 384) padded weights; pad rows/cols contribute exactly 0 ----
    h11 = jnp.maximum(
        jnp.dot(h1, w2_ref[...], preferred_element_type=jnp.float32) + b2_ref[...], 0.0)
    h22 = jnp.maximum(
        jnp.dot(h2, w5_ref[...], preferred_element_type=jnp.float32) + b5_ref[...], 0.0)

    # ---- fused heads: single lane-dense (TM, 128) output; col 0 = q1, col 1 = q2 ----
    q12 = (jnp.dot(h11.astype(bf16), w3c_ref[...], preferred_element_type=jnp.float32)
           + jnp.dot(h22.astype(bf16), w6c_ref[...], preferred_element_type=jnp.float32)
           + b36_ref[...])

    q12_ref[...] = q12.astype(q12_ref.dtype)
    x11_ref[...] = h11.astype(x11_ref.dtype)
    x22_ref[...] = h22.astype(x22_ref.dtype)


# ----------------------------------------------------------------------------- wrapper
def _pick_tm(batch):
    """Batch tile: big tiles for big batches, >=2 grid steps for mid batches (v7x
    megacore), multiple of 16 for bf16 sublane packing on small batches."""
    if batch >= 1024:
        return 512
    if batch >= 256:
        # split into (at least) 2 tiles so ("parallel",) can use both TensorCores
        half = -(-batch // 2)
        return max(128, ((half + 15) // 16) * 16)
    return max(16, ((batch + 15) // 16) * 16)


@jax.jit
def critic_forward(x, u, params):
    """Pallas forward. Returns (q1, q2, x11, x22) exactly as Critic.forward."""
    (w14, b14, w2p, b2p, w5p, b5p, w3c, w6c, b36) = params
    B = x.shape[0]
    in_dim = x.shape[1] + u.shape[1]

    TM = _pick_tm(B)
    Bp = pl.cdiv(B, TM) * TM

    # One-time concat (cheaper than per-tile split DMAs / an extra tiny-K MXU pass).
    xu = jnp.concatenate([x, u], axis=1)
    if Bp != B:
        xu = jnp.pad(xu, ((0, Bp - B), (0, 0)))   # pad rows produce junk, sliced off below

    def row_spec(d):                         # batch-tiled arrays
        return pl.BlockSpec((TM, d), lambda i: (i, 0))

    def resident_spec(arr):                  # weights/biases: full block, constant index
        return pl.BlockSpec(arr.shape, lambda i: (0, 0))

    in_specs = [row_spec(in_dim)] + [resident_spec(p) for p in params]
    out_specs = (row_spec(QP), row_spec(H2P), row_spec(H2P))
    out_shapes = (
        jax.ShapeDtypeStruct((Bp, QP), jnp.float32),    # q12 (q1 | q2 | zeros)
        jax.ShapeDtypeStruct((Bp, H2P), jnp.float32),   # x11 padded to 384
        jax.ShapeDtypeStruct((Bp, H2P), jnp.float32),   # x22 padded to 384
    )

    flops = 2 * Bp * (in_dim * 2 * H1P + 2 * H1P * H2P + 2 * H2P * QP)
    param_bytes = sum(int(p.size) * p.dtype.itemsize for p in params)
    bytes_accessed = int(xu.size) * 4 + param_bytes + Bp * (QP + 2 * H2P) * 4

    q12, x11p, x22p = pl.pallas_call(
        critic_kernel,
        out_shape=out_shapes,
        grid=(Bp // TM,),
        in_specs=in_specs,
        out_specs=out_specs,
        compiler_params=pltpu.CompilerParams(
            dimension_semantics=("parallel",),          # megacore sharding on v7x
            vmem_limit_bytes=32 * 1024 * 1024,
        ),
        cost_estimate=pl.CostEstimate(
            flops=flops, transcendentals=0, bytes_accessed=bytes_accessed),
    )(xu, *params)

    q1 = q12[:B, 0:1]
    q2 = q12[:B, 1:2]
    return q1, q2, x11p[:B, :H2], x22p[:B, :H2]


# ----------------------------------------------------------------------------- params
def init_linear(key, in_dim, out_dim):
    """PyTorch nn.Linear default init, weight already transposed to (in, out)."""
    kw, kb = jax.random.split(key)
    bound = 1.0 / jnp.sqrt(jnp.float32(in_dim))
    w = jax.random.uniform(kw, (in_dim, out_dim), jnp.float32, -bound, bound)
    b = jax.random.uniform(kb, (1, out_dim), jnp.float32, -bound, bound)
    return w, b


def init_critic_raw_params(key, state_dim, action_dim):
    in_dim = state_dim + action_dim
    keys = jax.random.split(key, 6)
    w1, b1 = init_linear(keys[0], in_dim, 400)
    w2, b2 = init_linear(keys[1], 400, 300)
    w3, b3 = init_linear(keys[2], 300, 1)
    w4, b4 = init_linear(keys[3], in_dim, 400)
    w5, b5 = init_linear(keys[4], 400, 300)
    w6, b6 = init_linear(keys[5], 300, 1)
    return (w1, b1, w2, b2, w3, b3, w4, b4, w5, b5, w6, b6)


def pack_critic_params(raw):
    """Fuse / pad / transpose / quantize raw per-layer params into kernel layout."""
    (w1, b1, w2, b2, w3, b3, w4, b4, w5, b5, w6, b6) = raw
    bf16 = jnp.bfloat16
    in_dim = w1.shape[0]

    # layer 1: [W1 | 0_112 | W4 | 0_112]  -> (in_dim, 1024), bias likewise (zero pad)
    w14 = jnp.zeros((in_dim, 2 * H1P), jnp.float32)
    w14 = w14.at[:, :H1].set(w1).at[:, H1P:H1P + H1].set(w4)
    b14 = jnp.zeros((1, 2 * H1P), jnp.float32)
    b14 = b14.at[:, :H1].set(b1).at[:, H1P:H1P + H1].set(b4)

    # layer 2: rows padded 400->512 (zeros, multiply the zero h12 pad), cols 300->384
    def pad_l2(w, b):
        wp = jnp.zeros((H1P, H2P), jnp.float32).at[:H1, :H2].set(w)
        bp = jnp.zeros((1, H2P), jnp.float32).at[:, :H2].set(b)
        return wp.astype(bf16), bp

    w2p, b2p = pad_l2(w2, b2)
    w5p, b5p = pad_l2(w5, b5)

    # heads: (384, 128); q1 lands in column 0 (from h11 @ w3c), q2 in column 1
    w3c = jnp.zeros((H2P, QP), jnp.float32).at[:H2, 0:1].set(w3).astype(bf16)
    w6c = jnp.zeros((H2P, QP), jnp.float32).at[:H2, 1:2].set(w6).astype(bf16)
    b36 = jnp.zeros((1, QP), jnp.float32).at[:, 0:1].set(b3).at[:, 1:2].set(b6)

    return (w14.astype(bf16), b14, w2p, b2p, w5p, b5p, w3c, w6c, b36)


# ----------------------------------------------------------------------------- reference
def critic_forward_ref(x, u, params):
    """Plain-JAX reference using the same bf16-weight / f32-accumulate math.
    (The true f32 PyTorch Critic differs from this by ~bf16 precision, by design.)"""
    (w14, b14, w2p, b2p, w5p, b5p, w3c, w6c, b36) = params
    bf16 = jnp.bfloat16
    xu = jnp.concatenate([x, u], axis=1).astype(bf16)
    h12 = jnp.maximum(jnp.dot(xu, w14, preferred_element_type=jnp.float32) + b14, 0.0)
    h1 = h12[:, :H1P].astype(bf16)
    h2 = h12[:, H1P:].astype(bf16)
    h11 = jnp.maximum(jnp.dot(h1, w2p, preferred_element_type=jnp.float32) + b2p, 0.0)
    h22 = jnp.maximum(jnp.dot(h2, w5p, preferred_element_type=jnp.float32) + b5p, 0.0)
    q12 = (jnp.dot(h11.astype(bf16), w3c, preferred_element_type=jnp.float32)
           + jnp.dot(h22.astype(bf16), w6c, preferred_element_type=jnp.float32) + b36)
    return q12[:, 0:1], q12[:, 1:2], h11[:, :H2], h22[:, :H2]


if __name__ == "__main__":
    state_dim, action_dim, batch = 16, 8, 8

    key = jax.random.PRNGKey(0)
    kp, kx, ku = jax.random.split(key, 3)

    raw = init_critic_raw_params(kp, state_dim, action_dim)
    params = pack_critic_params(raw)

    x = jax.random.normal(kx, (batch, state_dim), jnp.float32)
    u = jax.random.normal(ku, (batch, action_dim), jnp.float32)

    q1, q2, x11, x22 = critic_forward(x, u, params)
    jax.block_until_ready((q1, q2, x11, x22))

    # Sanity check against the plain-JAX reference (same bf16-weight math).
    r1, r2, r11, r22 = critic_forward_ref(x, u, params)
    assert q1.shape == (batch, 1) and q2.shape == (batch, 1)
    assert x11.shape == (batch, 300) and x22.shape == (batch, 300)
    assert jnp.allclose(q1, r1, atol=2e-3, rtol=2e-3)
    assert jnp.allclose(q2, r2, atol=2e-3, rtol=2e-3)
    assert jnp.allclose(x11, r11, atol=2e-3, rtol=2e-3)
    assert jnp.allclose(x22, r22, atol=2e-3, rtol=2e-3)

    print("KERNEL_OK")
</pallas_src>

<mosaic_0001>
module attributes {stable_mosaic.version = 11 : i64} {
  func.func @critic_kernel(%arg0: i32, %arg1: memref<16x24xf32, #tpu.memory_space<vmem>>, %arg2: memref<24x1024xbf16, #tpu.memory_space<vmem>>, %arg3: memref<1x1024xf32, #tpu.memory_space<vmem>>, %arg4: memref<512x384xbf16, #tpu.memory_space<vmem>>, %arg5: memref<1x384xf32, #tpu.memory_space<vmem>>, %arg6: memref<512x384xbf16, #tpu.memory_space<vmem>>, %arg7: memref<1x384xf32, #tpu.memory_space<vmem>>, %arg8: memref<384x128xbf16, #tpu.memory_space<vmem>>, %arg9: memref<384x128xbf16, #tpu.memory_space<vmem>>, %arg10: memref<1x128xf32, #tpu.memory_space<vmem>>, %arg11: memref<16x128xf32, #tpu.memory_space<vmem>>, %arg12: memref<16x384xf32, #tpu.memory_space<vmem>>, %arg13: memref<16x384xf32, #tpu.memory_space<vmem>>) attributes {dimension_semantics = [#tpu.dimension_semantics<parallel>], iteration_bounds = array<i64: 1>, scalar_prefetch = 0 : i64, scratch_operands = 0 : i64, tpu.core_type = #tpu.core_type<tc>, window_params = [{transform_indices = @transform_0, window_bounds = array<i64: 16, 24>}, {pipeline_mode = #tpu.pipeline_mode<synchronous>, transform_indices = @transform_1, window_bounds = array<i64: 24, 1024>}, {pipeline_mode = #tpu.pipeline_mode<synchronous>, transform_indices = @transform_2, window_bounds = array<i64: 1, 1024>}, {pipeline_mode = #tpu.pipeline_mode<synchronous>, transform_indices = @transform_3, window_bounds = array<i64: 512, 384>}, {pipeline_mode = #tpu.pipeline_mode<synchronous>, transform_indices = @transform_4, window_bounds = array<i64: 1, 384>}, {pipeline_mode = #tpu.pipeline_mode<synchronous>, transform_indices = @transform_5, window_bounds = array<i64: 512, 384>}, {pipeline_mode = #tpu.pipeline_mode<synchronous>, transform_indices = @transform_6, window_bounds = array<i64: 1, 384>}, {pipeline_mode = #tpu.pipeline_mode<synchronous>, transform_indices = @transform_7, window_bounds = array<i64: 384, 128>}, {pipeline_mode = #tpu.pipeline_mode<synchronous>, transform_indices = @transform_8, window_bounds = array<i64: 384, 128>}, {pipeline_mode = #tpu.pipeline_mode<synchronous>, transform_indices = @transform_9, window_bounds = array<i64: 1, 128>}, {transform_indices = @transform_10, window_bounds = array<i64: 16, 128>}, {transform_indices = @transform_11, window_bounds = array<i64: 16, 384>}, {transform_indices = @transform_12, window_bounds = array<i64: 16, 384>}]} {
    %c0 = arith.constant 0 : index
    %c0_0 = arith.constant 0 : index
    %0 = vector.load %arg1[%c0, %c0_0] : memref<16x24xf32, #tpu.memory_space<vmem>>, vector<16x24xf32>
    %1 = arith.truncf %0 : vector<16x24xf32> to vector<16x24xbf16>
    %c0_1 = arith.constant 0 : index
    %c0_2 = arith.constant 0 : index
    %2 = vector.load %arg2[%c0_1, %c0_2] : memref<24x1024xbf16, #tpu.memory_space<vmem>>, vector<24x1024xbf16>
    %cst = arith.constant dense<0.000000e+00> : vector<16x1024xf32>
    %3 = tpu.matmul %1, %2, %cst {dimension_numbers = #tpu.dot_dimension_numbers<[1], [0], [0], [1], [0, 0, 1, 1], [], []>} : vector<16x24xbf16>, vector<24x1024xbf16>, vector<16x1024xf32> -> vector<16x1024xf32>
    %c0_3 = arith.constant 0 : index
    %c0_4 = arith.constant 0 : index
    %4 = vector.load %arg3[%c0_3, %c0_4] : memref<1x1024xf32, #tpu.memory_space<vmem>>, vector<1x1024xf32>
    %5 = vector.broadcast %4 : vector<1x1024xf32> to vector<16x1024xf32>
    %6 = arith.addf %3, %5 : vector<16x1024xf32>
    %cst_5 = arith.constant 0.000000e+00 : f32
    %7 = vector.broadcast %cst_5 : f32 to vector<16x1024xf32>
    %8 = arith.maximumf %6, %7 : vector<16x1024xf32>
    %9 = vector.extract_strided_slice %8 {offsets = [0, 0], sizes = [16, 512], strides = [1, 1]} : vector<16x1024xf32> to vector<16x512xf32>
    %10 = arith.truncf %9 : vector<16x512xf32> to vector<16x512xbf16>
    %11 = vector.extract_strided_slice %8 {offsets = [0, 512], sizes = [16, 512], strides = [1, 1]} : vector<16x1024xf32> to vector<16x512xf32>
    %12 = arith.truncf %11 : vector<16x512xf32> to vector<16x512xbf16>
    %c0_6 = arith.constant 0 : index
    %c0_7 = arith.constant 0 : index
    %13 = vector.load %arg4[%c0_6, %c0_7] : memref<512x384xbf16, #tpu.memory_space<vmem>>, vector<512x384xbf16>
    %cst_8 = arith.constant dense<0.000000e+00> : vector<16x384xf32>
    %14 = tpu.matmul %10, %13, %cst_8 {dimension_numbers = #tpu.dot_dimension_numbers<[1], [0], [0], [1], [0, 0, 1, 1], [], []>} : vector<16x512xbf16>, vector<512x384xbf16>, vector<16x384xf32> -> vector<16x384xf32>
    %c0_9 = arith.constant 0 : index
    %c0_10 = arith.constant 0 : index
    %15 = vector.load %arg5[%c0_9, %c0_10] : memref<1x384xf32, #tpu.memory_space<vmem>>, vector<1x384xf32>
    %16 = vector.broadcast %15 : vector<1x384xf32> to vector<16x384xf32>
    %17 = arith.addf %14, %16 : vector<16x384xf32>
    %cst_11 = arith.constant 0.000000e+00 : f32
    %18 = vector.broadcast %cst_11 : f32 to vector<16x384xf32>
    %19 = arith.maximumf %17, %18 : vector<16x384xf32>
    %c0_12 = arith.constant 0 : index
    %c0_13 = arith.constant 0 : index
    %20 = vector.load %arg6[%c0_12, %c0_13] : memref<512x384xbf16, #tpu.memory_space<vmem>>, vector<512x384xbf16>
    %cst_14 = arith.constant dense<0.000000e+00> : vector<16x384xf32>
    %21 = tpu.matmul %12, %20, %cst_14 {dimension_numbers = #tpu.dot_dimension_numbers<[1], [0], [0], [1], [0, 0, 1, 1], [], []>} : vector<16x512xbf16>, vector<512x384xbf16>, vector<16x384xf32> -> vector<16x384xf32>
    %c0_15 = arith.constant 0 : index
    %c0_16 = arith.constant 0 : index
    %22 = vector.load %arg7[%c0_15, %c0_16] : memref<1x384xf32, #tpu.memory_space<vmem>>, vector<1x384xf32>
    %23 = vector.broadcast %22 : vector<1x384xf32> to vector<16x384xf32>
    %24 = arith.addf %21, %23 : vector<16x384xf32>
    %cst_17 = arith.constant 0.000000e+00 : f32
    %25 = vector.broadcast %cst_17 : f32 to vector<16x384xf32>
    %26 = arith.maximumf %24, %25 : vector<16x384xf32>
    %27 = arith.truncf %19 : vector<16x384xf32> to vector<16x384xbf16>
    %c0_18 = arith.constant 0 : index
    %c0_19 = arith.constant 0 : index
    %28 = vector.load %arg8[%c0_18, %c0_19] : memref<384x128xbf16, #tpu.memory_space<vmem>>, vector<384x128xbf16>
    %cst_20 = arith.constant dense<0.000000e+00> : vector<16x128xf32>
    %29 = tpu.matmul %27, %28, %cst_20 {dimension_numbers = #tpu.dot_dimension_numbers<[1], [0], [0], [1], [0, 0, 1, 1], [], []>} : vector<16x384xbf16>, vector<384x128xbf16>, vector<16x128xf32> -> vector<16x128xf32>
    %30 = arith.truncf %26 : vector<16x384xf32> to vector<16x384xbf16>
    %c0_21 = arith.constant 0 : index
    %c0_22 = arith.constant 0 : index
    %31 = vector.load %arg9[%c0_21, %c0_22] : memref<384x128xbf16, #tpu.memory_space<vmem>>, vector<384x128xbf16>
    %cst_23 = arith.constant dense<0.000000e+00> : vector<16x128xf32>
    %32 = tpu.matmul %30, %31, %cst_23 {dimension_numbers = #tpu.dot_dimension_numbers<[1], [0], [0], [1], [0, 0, 1, 1], [], []>} : vector<16x384xbf16>, vector<384x128xbf16>, vector<16x128xf32> -> vector<16x128xf32>
    %33 = arith.addf %29, %32 : vector<16x128xf32>
    %c0_24 = arith.constant 0 : index
    %c0_25 = arith.constant 0 : index
    %34 = vector.load %arg10[%c0_24, %c0_25] : memref<1x128xf32, #tpu.memory_space<vmem>>, vector<1x128xf32>
    %35 = vector.broadcast %34 : vector<1x128xf32> to vector<16x128xf32>
    %36 = arith.addf %33, %35 : vector<16x128xf32>
    %c0_26 = arith.constant 0 : index
    %c0_27 = arith.constant 0 : index
    %37 = vector.load %arg11[%c0_26, %c0_27] : memref<16x128xf32, #tpu.memory_space<vmem>>, vector<16x128xf32>
    tpu.vector_store %arg11[%c0_26, %c0_27], %36 {strides = array<i32>} : memref<16x128xf32, #tpu.memory_space<vmem>>, vector<16x128xf32>,
    %c0_28 = arith.constant 0 : index
    %c0_29 = arith.constant 0 : index
    %38 = vector.load %arg12[%c0_28, %c0_29] : memref<16x384xf32, #tpu.memory_space<vmem>>, vector<16x384xf32>
    tpu.vector_store %arg12[%c0_28, %c0_29], %19 {strides = array<i32>} : memref<16x384xf32, #tpu.memory_space<vmem>>, vector<16x384xf32>,
    %c0_30 = arith.constant 0 : index
    %c0_31 = arith.constant 0 : index
    %39 = vector.load %arg13[%c0_30, %c0_31] : memref<16x384xf32, #tpu.memory_space<vmem>>, vector<16x384xf32>
    tpu.vector_store %arg13[%c0_30, %c0_31], %26 {strides = array<i32>} : memref<16x384xf32, #tpu.memory_space<vmem>>, vector<16x384xf32>,
    return
  }
  func.func @transform_0(%arg0: i32) -> (i32, i32) {
    %c0_i32 = arith.constant 0 : i32
    %c0_i32_0 = arith.constant 0 : i32
    return %arg0, %c0_i32 : i32, i32
  }
  func.func @transform_1(%arg0: i32) -> (i32, i32) {
    %c0_i32 = arith.constant 0 : i32
    %c0_i32_0 = arith.constant 0 : i32
    %c0_i32_1 = arith.constant 0 : i32
    return %c0_i32, %c0_i32_0 : i32, i32
  }
  func.func @transform_2(%arg0: i32) -> (i32, i32) {
    %c0_i32 = arith.constant 0 : i32
    %c0_i32_0 = arith.constant 0 : i32
    %c0_i32_1 = arith.constant 0 : i32
    return %c0_i32, %c0_i32_0 : i32, i32
  }
  func.func @transform_3(%arg0: i32) -> (i32, i32) {
    %c0_i32 = arith.constant 0 : i32
    %c0_i32_0 = arith.constant 0 : i32
    %c0_i32_1 = arith.constant 0 : i32
    return %c0_i32, %c0_i32_0 : i32, i32
  }
  func.func @transform_4(%arg0: i32) -> (i32, i32) {
    %c0_i32 = arith.constant 0 : i32
    %c0_i32_0 = arith.constant 0 : i32
    %c0_i32_1 = arith.constant 0 : i32
    return %c0_i32, %c0_i32_0 : i32, i32
  }
  func.func @transform_5(%arg0: i32) -> (i32, i32) {
    %c0_i32 = arith.constant 0 : i32
    %c0_i32_0 = arith.constant 0 : i32
    %c0_i32_1 = arith.constant 0 : i32
    return %c0_i32, %c0_i32_0 : i32, i32
  }
  func.func @transform_6(%arg0: i32) -> (i32, i32) {
    %c0_i32 = arith.constant 0 : i32
    %c0_i32_0 = arith.constant 0 : i32
    %c0_i32_1 = arith.constant 0 : i32
    return %c0_i32, %c0_i32_0 : i32, i32
  }
  func.func @transform_7(%arg0: i32) -> (i32, i32) {
    %c0_i32 = arith.constant 0 : i32
    %c0_i32_0 = arith.constant 0 : i32
    %c0_i32_1 = arith.constant 0 : i32
    return %c0_i32, %c0_i32_0 : i32, i32
  }
  func.func @transform_8(%arg0: i32) -> (i32, i32) {
    %c0_i32 = arith.constant 0 : i32
    %c0_i32_0 = arith.constant 0 : i32
    %c0_i32_1 = arith.constant 0 : i32
    return %c0_i32, %c0_i32_0 : i32, i32
  }
  func.func @transform_9(%arg0: i32) -> (i32, i32) {
    %c0_i32 = arith.constant 0 : i32
    %c0_i32_0 = arith.constant 0 : i32
    %c0_i32_1 = arith.constant 0 : i32
    return %c0_i32, %c0_i32_0 : i32, i32
  }
  func.func @transform_10(%arg0: i32) -> (i32, i32) {
    %c0_i32 = arith.constant 0 : i32
    %c0_i32_0 = arith.constant 0 : i32
    return %arg0, %c0_i32 : i32, i32
  }
  func.func @transform_11(%arg0: i32) -> (i32, i32) {
    %c0_i32 = arith.constant 0 : i32
    %c0_i32_0 = arith.constant 0 : i32
    return %arg0, %c0_i32 : i32, i32
  }
  func.func @transform_12(%arg0: i32) -> (i32, i32) {
    %c0_i32 = arith.constant 0 : i32
    %c0_i32_0 = arith.constant 0 : i32
    return %arg0, %c0_i32 : i32, i32
  }
}

</mosaic_0001>

<bundles_post_ra>
// kernel: critic_forward.1
= control target key start
LH: loop header
LB: loop body
LE: loop exit
PB: predicated region body
PF: predicated region fallthrough
CT: control target
= control target key end

     0   :  { %18 = vsyncpa [#allocation3], 0  ;;  %s4163_s0 = inlined_call_operand.vmem [shape: f32[16,24], index: 0, kind: input, shape index: {}]   ;;  %s4164_s1 = inlined_call_operand.hbm [shape: bf16[24,1024], index: 1, kind: input, shape index: {}]   ;;  %s4165_s2 = inlined_call_operand.vmem [shape: f32[1,1024], index: 2, kind: input, shape index: {}]   ;;  %s4166_s3 = inlined_call_operand.hbm [shape: bf16[512,384], index: 3, kind: input, shape index: {}]   ;;  %s4167_s4 = inlined_call_operand.vmem [shape: f32[1,384], index: 4, kind: input, shape index: {}]   ;;  %s4168_s5 = inlined_call_operand.hbm [shape: bf16[512,384], index: 5, kind: input, shape index: {}]   ;;  %s4169_s6 = inlined_call_operand.vmem [shape: f32[1,384], index: 6, kind: input, shape index: {}]   ;;  %s4170_s7 = inlined_call_operand.hbm [shape: bf16[384,128], index: 7, kind: input, shape index: {}]   ;;  %s4171_s8 = inlined_call_operand.hbm [shape: bf16[384,128], index: 8, kind: input, shape index: {}]   ;;  %s4172_s9 = inlined_call_operand.vmem [shape: f32[1,128], index: 9, kind: input, shape index: {}]   ;;  %s4173_s10 = inlined_call_operand.vmem [shape: f32[16,128], index: 10, kind: output, shape index: {0}]   ;;  %s4174_s11 = inlined_call_operand.vmem [shape: f32[16,384], index: 11, kind: output, shape index: {1}]   ;;  %s4175_s12 = inlined_call_operand.vmem [shape: f32[16,384], index: 12, kind: output, shape index: {2}]  }
   0x1   :  { %19 = vsyncpa [#allocation5], 0  ;;  %s42_s23 = sshll.u32 %s4166_s3, 4  ;;  %s43_s23 = int_to_ptr.hbm [resolvable:$true] %s42_s23 }
   0x2   :  { %20 = vsyncpa [#allocation8], 0  ;;  %s3914_s24 = smov [#allocation4]   ;;  %s72_s28 = sshll.u32 %s4170_s7, 4  ;;  %s73_s28 = int_to_ptr.hbm [resolvable:$true] %s72_s28 }
   0x3   :  { %s44_s25 = sshll.u32 %s3914_s24, 4  ;;  %s3915_s29 = smov 192   ;;  %s45_s25 = int_to_ptr.vmem [resolvable:$true] %s44_s25 }
   0x4   :  { %s3916_s30 = smov 12   ;;  %s3917_s13 = smov [#allocation7]  }
   0x5   :  { %50 = dma.hbm_to_vmem [thread:$0]  %s43_s23, 12288, %s45_s25, [#allocation5], %s3915_s29, %s3915_s29, %s3916_s30  }
   0x6   :  { %s74_s14 = sshll.u32 %s3917_s13, 4  ;;  %s3918_s15 = smov 64   ;;  %s75_s14 = int_to_ptr.vmem [resolvable:$true] %s74_s14 }
   0x7   :  { %s3919_s16 = smov 4   ;;  %s27_s18 = sshll.u32 %s4164_s1, 4  ;;  %s28_s18 = int_to_ptr.hbm [resolvable:$true] %s27_s18 }
   0x8   :  { %80 = dma.hbm_to_vmem [thread:$0]  %s73_s28, 3072, %s75_s14, [#allocation8], %s3918_s15, %s3918_s15, %s3919_s16  }
   0x9   :  { %s3920_s19 = smov [#allocation2]   ;;  %s57_s22 = sshll.u32 %s4168_s5, 4  ;;  %s58_s22 = int_to_ptr.hbm [resolvable:$true] %s57_s22 }
   0xa   :  { %s29_s20 = sshll.u32 %s3920_s19, 4  ;;  %s3921_s23 = smov 512   ;;  %s30_s20 = int_to_ptr.vmem [resolvable:$true] %s29_s20 }
   0xb   :  { %s3922_s24 = smov 32   ;;  %s3923_s25 = smov [#allocation6]  }
   0xc   :  { %35 = dma.hbm_to_vmem [thread:$0]  %s28_s18, 1536, %s30_s20, [#allocation3], %s3921_s23, %s3921_s23, %s3922_s24  }
   0xd   :  { %s59_s26 = sshll.u32 %s3923_s25, 4  ;;  %s85_s13 = sshll.u32 %s4171_s8, 4  ;;  %s60_s26 = int_to_ptr.vmem [resolvable:$true] %s59_s26  ;;  %s86_s13 = int_to_ptr.hbm [resolvable:$true] %s85_s13 }
   0xe   :  { %65 = dma.hbm_to_vmem [thread:$0]  %s58_s22, 12288, %s60_s26, [#allocation5], %s3915_s29, %s3915_s29, %s3916_s30  }
   0xf   :  { %s3924_s1 = smov [#allocation9]  }
  0x10   :  { %s87_s14 = sshll.u32 %s3924_s1, 4  ;;  %s88_s14 = int_to_ptr.vmem [resolvable:$true] %s87_s14 }
  0x11   :  { %93 = dma.hbm_to_vmem [thread:$0]  %s86_s13, 3072, %s88_s14, [#allocation8], %s3918_s15, %s3918_s15, %s3919_s16  }
  0x12   :  { %3908 = dma.done.wait [#allocation3], 1536  }
  0x13   :  { %3909 = vsyncadd [#allocation3], 4294965760 }
  0x14   :  { %3910 = dma.done.wait [#allocation5], 24576  }
  0x15   :  { %3911 = vsyncadd [#allocation5], 4294942720 }
  0x16   :  { %3912 = dma.done.wait [#allocation8], 6144  }
  0x17   :  { %3913 = vsyncadd [#allocation8], 4294961152  ;;  %v128_v0 = vld [vmem:[#allocation2 + $0x40] sm:$0xff]  ;;  %vm214_vm0 = vcmask 1043456   ;;  %v129_v7 = vld [vmem:[#allocation2 + $0x48] sm:$0xff]  ;;  %vm210_vm1 = vcmask 195584  }
  0x18   :  { %v2530_v1 = vld [vmem:[#allocation2] sm:$0xf]  ;;  %v178_v2 = vunpack.c.l.b16 %v128_v0  ;;  %v179_v3 = vunpack.c.h.b16 %v128_v0  ;;  %v3528_v5 = vld [vmem:[#allocation2 + $0x4] sm:$0xf]  ;;  %v180_v10 = vunpack.c.l.b16 %v129_v7  ;;  %v181_v13 = vunpack.c.h.b16 %v129_v7  ;;  %v131_v14 = vld [vmem:[#allocation2 + $0x58] sm:$0xff] }
  0x19   :  { %v3532_v4 = vld [vmem:[#allocation2 + $0x1c] sm:$0xf0]  ;;  %v2532_v6 = vld [vmem:[#allocation2 + $0x20] sm:$0xf0]  ;;  %v130_v15 = vld [vmem:[#allocation2 + $0x50] sm:$0xff]  ;;  %v184_v19 = vunpack.c.l.b16 %v131_v14  ;;  %v185_v24 = vunpack.c.h.b16 %v131_v14 }
  0x1a   :  { %v194_v8 = vpack.c.b16 %v178_v2, %v178_v2  ;;  %v195_v9 = vpack.c.b16 %v179_v3, %v179_v3  ;;  %v2531_v11 = vor.u32 %v3532_v4, %v2530_v1  ;;  %v2535_v12 = vor.u32 %v3528_v5, %v2532_v6  ;;  %v117_v20 = vld [vmem:[%s4163_s0] sm:$0xff]  ;;  %v118_v21 = vld [vmem:[%s4163_s0 + $0x8] sm:$0xff]  ;;  %v2546_v39 = vld [vmem:[#allocation2 + $0x10] sm:$0xf] }
  0x1b   :  { %v196_v18 = vpack.c.b16 %v180_v10, %v180_v10  ;;  %v197_v22 = vpack.c.b16 %v181_v13, %v181_v13  ;;  %v2538_v23 = vld [vmem:[#allocation2 + $0x8] sm:$0xf]  ;;  %v182_v25 = vunpack.c.l.b16 %v130_v15  ;;  %v183_v26 = vunpack.c.h.b16 %v130_v15  ;;  %v3529_v31 = vld [vmem:[#allocation2 + $0xc] sm:$0xf]  ;;  %v3534_v40 = vld [vmem:[#allocation2 + $0x2c] sm:$0xf0] }
  0x1c   :  { %v216_v16 = vsel %vm214_vm0, %v194_v8, 0  ;;  %v219_v17 = vsel %vm214_vm0, %v195_v9, 0  ;;  %v3533_v28 = vld [vmem:[#allocation2 + $0x24] sm:$0xf0]  ;;  %v200_v29 = vpack.c.b16 %v184_v19, %v184_v19  ;;  %v2540_v32 = vld [vmem:[#allocation2 + $0x28] sm:$0xf0]  ;;  %v201_v33 = vpack.c.b16 %v185_v24, %v185_v24 }
  0x1d   :  { %245 = vmatpush.bf16.msra.mxu2 %v216_v16  ;;  %259 = vmatpush.bf16.msra.mxu3 %v219_v17  ;;  %v222_v27 = vsel %vm214_vm0, %v196_v18, 0  ;;  %v225_v30 = vsel %vm214_vm0, %v197_v22, 0  ;;  %v198_v34 = vpack.c.b16 %v182_v25, %v182_v25  ;;  %v199_v35 = vpack.c.b16 %v183_v26, %v183_v26  ;;  %v2554_v43 = vld [vmem:[#allocation2 + $0x18] sm:$0xf]  ;;  %v3531_v47 = vld [vmem:[#allocation2 + $0x1c] sm:$0xf] }
  0x1e   :  { %v4015_v36 = vpack.c.bf16 %v118_v21, %v117_v20  ;;  %v2539_v41 = vor.u32 %v3533_v28, %v2538_v23  ;;  %v2543_v42 = vor.u32 %v3529_v31, %v2540_v32  ;;  %v3535_v44 = vld [vmem:[#allocation2 + $0x34] sm:$0xf0]  ;;  %v234_v45 = vsel %vm214_vm0, %v200_v29, 0  ;;  %v2556_v48 = vld [vmem:[#allocation2 + $0x38] sm:$0xf0] }
  0x1f   :  { %v228_v37 = vsel %vm214_vm0, %v198_v34, 0  ;;  %v231_v38 = vsel %vm214_vm0, %v199_v35, 0  ;;  %v237_v46 = vsel %vm214_vm0, %v201_v33, 0  ;;  %v2547_v49 = vor.u32 %v3534_v40, %v2546_v39  ;;  %v3530_v50 = vld [vmem:[#allocation2 + $0x14] sm:$0xf] }
  0x20   :  { %301 = vmatpush.bf16.msra.mxu0 %v228_v37  ;;  %315 = vmatpush.bf16.msra.mxu1 %v231_v38  ;;  %v2548_v51 = vld [vmem:[#allocation2 + $0x30] sm:$0xf0]  ;;  %v2654_v52 = vld [vmem:[#allocation4 + $0xa8] sm:$0xf]  ;;  %v2642_v59 = vld [vmem:[#allocation4 + $0x90] sm:$0xf]  ;;  %v2555_v62 = vor.u32 %v3535_v44, %v2554_v43  ;;  %v2559_v63 = vor.u32 %v3531_v47, %v2556_v48 }
  0x21   :  { %246 = vmatpush.bf16.msra.mxu2 %v2531_v11  ;;  %260 = vmatpush.bf16.msra.mxu3 %v2535_v12  ;;  %v2551_v53 = vor.u32 %v3530_v50, %v2548_v51  ;;  %v3558_v54 = vld [vmem:[#allocation4 + $0xb0] sm:$0xf0]  ;;  %v2750_v55 = vld [vmem:[#allocation4 + $0x168] sm:$0xf]  ;;  %v3555_v60 = vld [vmem:[#allocation4 + $0x98] sm:$0xf0] }
  0x22   :  { %v3582_v56 = vld [vmem:[#allocation4 + $0x170] sm:$0xf0]  ;;  %v2655_v57 = vor.u32 %v3558_v54, %v2654_v52  ;;  %v2738_v61 = vld [vmem:[#allocation4 + $0x150] sm:$0xf]  ;;  %v3579_v0 = vld [vmem:[#allocation4 + $0x158] sm:$0xf0]  ;;  %v2643_v1 = vor.u32 %v3555_v60, %v2642_v59 }
  0x23   :  { %v2751_v58 = vor.u32 %v3582_v56, %v2750_v55  ;;  %v2739_v2 = vor.u32 %v3579_v0, %v2738_v61  ;;  %v2630_v3 = vld [vmem:[#allocation4 + $0x78] sm:$0xf]  ;;  %v3552_v4 = vld [vmem:[#allocation4 + $0x80] sm:$0xf0]  ;;  %v2618_v9 = vld [vmem:[#allocation4 + $0x60] sm:$0xf] }
  0x24   :  { %2560 = vmatmul.msk.bf16.vlgmr.msra.gmra.mxu2 %vm210_vm1, %v4015_v36  ;;  %2561 = vmatmul.msk.bf16.vlgmr.msra.gmra.mxu3 %vm210_vm1, %v4015_v36  ;;  %v2726_v5 = vld [vmem:[#allocation4 + $0x138] sm:$0xf]  ;;  %v3576_v6 = vld [vmem:[#allocation4 + $0x140] sm:$0xf0]  ;;  %v2631_v7 = vor.u32 %v3552_v4, %v2630_v3  ;;  %v3549_v10 = vld [vmem:[#allocation4 + $0x68] sm:$0xf0] }
  0x25   :  { %273 = vmatpush.bf16.msrb.mxu2 %v222_v27  ;;  %287 = vmatpush.bf16.msrb.mxu3 %v225_v30  ;;  %v2727_v8 = vor.u32 %v3576_v6, %v2726_v5  ;;  %v2714_v11 = vld [vmem:[#allocation4 + $0x120] sm:$0xf]  ;;  %v3573_v12 = vld [vmem:[#allocation4 + $0x128] sm:$0xf0]  ;;  %v2846_v13 = vld [vmem:[#allocation4 + $0x228] sm:$0xf]  ;;  %v2619_v17 = vor.u32 %v3549_v10, %v2618_v9 }
  0x26   :  { %302 = vmatpush.bf16.msra.mxu0 %v2547_v49  ;;  %316 = vmatpush.bf16.msra.mxu1 %v2551_v53  ;;  %v3606_v14 = vld [vmem:[#allocation4 + $0x230] sm:$0xf0]  ;;  %v2942_v15 = vld [vmem:[#allocation4 + $0x2e8] sm:$0xf]  ;;  %v2715_v18 = vor.u32 %v3573_v12, %v2714_v11  ;;  %v2834_v25 = vld [vmem:[#allocation4 + $0x210] sm:$0xf] }
  0x27   :  { %v3630_v16 = vld [vmem:[#allocation4 + $0x2f0] sm:$0xf0]  ;;  %v2606_v19 = vld [vmem:[#allocation4 + $0x48] sm:$0xf]  ;;  %v2847_v23 = vor.u32 %v3606_v14, %v2846_v13  ;;  %v3603_v26 = vld [vmem:[#allocation4 + $0x218] sm:$0xf0] }
  0x28   :  { %v3546_v20 = vld [vmem:[#allocation4 + $0x50] sm:$0xf0]  ;;  %v2702_v21 = vld [vmem:[#allocation4 + $0x108] sm:$0xf]  ;;  %v2943_v24 = vor.u32 %v3630_v16, %v2942_v15  ;;  %v2930_v27 = vld [vmem:[#allocation4 + $0x2d0] sm:$0xf]  ;;  %v2835_v35 = vor.u32 %v3603_v26, %v2834_v25 }
  0x29   :  { %274 = vmatpush.bf16.msrb.mxu2 %v2539_v41  ;;  %288 = vmatpush.bf16.msrb.mxu3 %v2543_v42  ;;  %v3570_v22 = vld [vmem:[#allocation4 + $0x110] sm:$0xf0]  ;;  %v3627_v28 = vld [vmem:[#allocation4 + $0x2d8] sm:$0xf0]  ;;  %v2607_v29 = vor.u32 %v3546_v20, %v2606_v19  ;;  %v2594_v31 = vld [vmem:[#allocation4 + $0x30] sm:$0xf] }
  0x2a   :  { %1023 = vmatpush.bf16.msrb.mxu0 %v2655_v57  ;;  %1037 = vmatpush.bf16.msrb.mxu1 %v2751_v58  ;;  %v2703_v30 = vor.u32 %v3570_v22, %v2702_v21  ;;  %v3543_v32 = vld [vmem:[#allocation4 + $0x38] sm:$0xf0]  ;;  %v2690_v33 = vld [vmem:[#allocation4 + $0xf0] sm:$0xf]  ;;  %v2931_v37 = vor.u32 %v3627_v28, %v2930_v27  ;;  %v2822_v38 = vld [vmem:[#allocation4 + $0x1f8] sm:$0xf] }
  0x2b   :  { %2564 = vmatmul.msk.bf16.vlgmr.msra.gmra.mxu0 %vm210_vm1, %v4015_v36  ;;  %2565 = vmatmul.msk.bf16.vlgmr.msra.gmra.mxu1 %vm210_vm1, %v4015_v36  ;;  %v3567_v34 = vld [vmem:[#allocation4 + $0xf8] sm:$0xf0]  ;;  %v3600_v39 = vld [vmem:[#allocation4 + $0x200] sm:$0xf0]  ;;  %v2918_v40 = vld [vmem:[#allocation4 + $0x2b8] sm:$0xf]  ;;  %v2595_v42 = vor.u32 %v3543_v32, %v2594_v31 }
  0x2c   :  { %v3624_v41 = vld [vmem:[#allocation4 + $0x2c0] sm:$0xf0]  ;;  %v2691_v43 = vor.u32 %v3567_v34, %v2690_v33  ;;  %v2582_v44 = vld [vmem:[#allocation4 + $0x18] sm:$0xf]  ;;  %v2823_v48 = vor.u32 %v3600_v39, %v2822_v38  ;;  %v2810_v50 = vld [vmem:[#allocation4 + $0x1e0] sm:$0xf] }
  0x2d   :  { %329 = vmatpush.bf16.msra.mxu2 %v234_v45  ;;  %343 = vmatpush.bf16.msra.mxu3 %v237_v46  ;;  %v3540_v45 = vld [vmem:[#allocation4 + $0x20] sm:$0xf0]  ;;  %v2678_v46 = vld [vmem:[#allocation4 + $0xd8] sm:$0xf]  ;;  %v2919_v49 = vor.u32 %v3624_v41, %v2918_v40  ;;  %v3597_v51 = vld [vmem:[#allocation4 + $0x1e8] sm:$0xf0] }
  0x2e   :  { %1024 = vmatpush.bf16.msrb.mxu0 %v2643_v1  ;;  %1038 = vmatpush.bf16.msrb.mxu1 %v2739_v2  ;;  %v3564_v47 = vld [vmem:[#allocation4 + $0xe0] sm:$0xf0]  ;;  %v2906_v52 = vld [vmem:[#allocation4 + $0x2a0] sm:$0xf]  ;;  %v3621_v53 = vld [vmem:[#allocation4 + $0x2a8] sm:$0xf0]  ;;  %v2583_v54 = vor.u32 %v3540_v45, %v2582_v44  ;;  %v2811_v60 = vor.u32 %v3597_v51, %v2810_v50 }
  0x2f   :  { %v2679_v55 = vor.u32 %v3564_v47, %v2678_v46  ;;  %v2570_v56 = vld [vmem:[#allocation4] sm:$0xf]  ;;  %v3537_v57 = vld [vmem:[#allocation4 + $0x8] sm:$0xf0]  ;;  %v2907_v61 = vor.u32 %v3621_v53, %v2906_v52  ;;  %v2752_v1 = vld [vmem:[#allocation4 + $0x174] sm:$0xf0] }
  0x30   :  { %v2666_v58 = vld [vmem:[#allocation4 + $0xc0] sm:$0xf]  ;;  %v3561_v59 = vld [vmem:[#allocation4 + $0xc8] sm:$0xf0]  ;;  %v2798_v2 = vld [vmem:[#allocation4 + $0x1c8] sm:$0xf]  ;;  %v2571_v6 = vor.u32 %v3537_v57, %v2570_v56 }
  0x31   :  { %330 = vmatpush.bf16.msra.mxu2 %v2555_v62  ;;  %344 = vmatpush.bf16.msra.mxu3 %v2559_v63  ;;  %v3557_v62 = vld [vmem:[#allocation4 + $0xac] sm:$0xf]  ;;  %v2656_v63 = vld [vmem:[#allocation4 + $0xb4] sm:$0xf0]  ;;  %v3594_v3 = vld [vmem:[#allocation4 + $0x1d0] sm:$0xf0] }
  0x32   :  { %1025 = vmatpush.bf16.msrb.mxu0 %v2631_v7  ;;  %1039 = vmatpush.bf16.msrb.mxu1 %v2727_v8  ;;  %v3581_v0 = vld [vmem:[#allocation4 + $0x16c] sm:$0xf]  ;;  %v2894_v4 = vld [vmem:[#allocation4 + $0x288] sm:$0xf]  ;;  %v3618_v5 = vld [vmem:[#allocation4 + $0x290] sm:$0xf0]  ;;  %v2667_v7 = vor.u32 %v3561_v59, %v2666_v58  ;;  %v2659_v8 = vor.u32 %v3557_v62, %v2656_v63  ;;  %v2799_v12 = vor.u32 %v3594_v3, %v2798_v2 }
  0x33   :  { %v2755_v9 = vor.u32 %v3581_v0, %v2752_v1  ;;  %v3554_v10 = vld [vmem:[#allocation4 + $0x94] sm:$0xf]  ;;  %v2644_v11 = vld [vmem:[#allocation4 + $0x9c] sm:$0xf0]  ;;  %v2895_v13 = vor.u32 %v3618_v5, %v2894_v4  ;;  %v2786_v16 = vld [vmem:[#allocation4 + $0x1b0] sm:$0xf] }
  0x34   :  { %2562 = vmatmul.msk.bf16.vlgmr.msrb.gmra.mxu2 %vm210_vm1, %v4015_v36  ;;  %2563 = vmatmul.msk.bf16.vlgmr.msrb.gmra.mxu3 %vm210_vm1, %v4015_v36  ;;  %v3578_v14 = vld [vmem:[#allocation4 + $0x154] sm:$0xf]  ;;  %v2740_v15 = vld [vmem:[#allocation4 + $0x15c] sm:$0xf0]  ;;  %v3615_v19 = vld [vmem:[#allocation4 + $0x278] sm:$0xf0]  ;;  %v2647_v20 = vor.u32 %v3554_v10, %v2644_v11 }
  0x35   :  { %1051 = vmatpush.bf16.msrb.mxu2 %v2847_v23  ;;  %1065 = vmatpush.bf16.msrb.mxu3 %v2943_v24  ;;  %v2743_v21 = vor.u32 %v3578_v14, %v2740_v15  ;;  %v3551_v22 = vld [vmem:[#allocation4 + $0x7c] sm:$0xf]  ;;  %v2632_v23 = vld [vmem:[#allocation4 + $0x84] sm:$0xf0]  ;;  %v2774_v28 = vld [vmem:[#allocation4 + $0x198] sm:$0xf] }
  0x36   :  { %1026 = vmatpush.bf16.msrb.mxu0 %v2619_v17  ;;  %1040 = vmatpush.bf16.msrb.mxu1 %v2715_v18  ;;  %v3591_v17 = vld [vmem:[#allocation4 + $0x1b8] sm:$0xf0]  ;;  %v2882_v18 = vld [vmem:[#allocation4 + $0x270] sm:$0xf]  ;;  %v2728_v27 = vld [vmem:[#allocation4 + $0x144] sm:$0xf0]  ;;  %v2635_v31 = vor.u32 %v3551_v22, %v2632_v23 }
  0x37   :  { %v2787_v24 = vor.u32 %v3591_v17, %v2786_v16  ;;  %v2883_v25 = vor.u32 %v3615_v19, %v2882_v18  ;;  %v3575_v26 = vld [vmem:[#allocation4 + $0x13c] sm:$0xf]  ;;  %v3548_v33 = vld [vmem:[#allocation4 + $0x64] sm:$0xf]  ;;  %v2716_v39 = vld [vmem:[#allocation4 + $0x12c] sm:$0xf0] }
  0x38   :  { %v2731_v32 = vor.u32 %v3575_v26, %v2728_v27  ;;  %v3572_v38 = vld [vmem:[#allocation4 + $0x124] sm:$0xf]  ;;  %v2858_v44 = vld [vmem:[#allocation4 + $0x240] sm:$0xf]  ;;  %v3609_v46 = vld [vmem:[#allocation4 + $0x248] sm:$0xf0] }
  0x39   :  { %1052 = vmatpush.bf16.msrb.mxu2 %v2835_v35  ;;  %1066 = vmatpush.bf16.msrb.mxu3 %v2931_v37  ;;  %v2620_v37 = vld [vmem:[#allocation4 + $0x6c] sm:$0xf0]  ;;  %v2719_v41 = vor.u32 %v3572_v38, %v2716_v39  ;;  %v3545_v47 = vld [vmem:[#allocation4 + $0x4c] sm:$0xf]  ;;  %v2704_v52 = vld [vmem:[#allocation4 + $0x114] sm:$0xf0] }
  0x3a   :  { %1027 = vmatpush.bf16.msrb.mxu0 %v2607_v29  ;;  %1041 = vmatpush.bf16.msrb.mxu1 %v2703_v30  ;;  %v3588_v29 = vld [vmem:[#allocation4 + $0x1a0] sm:$0xf0]  ;;  %v2623_v40 = vor.u32 %v3548_v33, %v2620_v37  ;;  %v3569_v51 = vld [vmem:[#allocation4 + $0x10c] sm:$0xf]  ;;  %v2944_v58 = vld [vmem:[#allocation4 + $0x2f4] sm:$0xf0] }
  0x3b   :  { %v3612_v30 = vld [vmem:[#allocation4 + $0x260] sm:$0xf0]  ;;  %v2775_v34 = vor.u32 %v3588_v29, %v2774_v28  ;;  %v3605_v53 = vld [vmem:[#allocation4 + $0x22c] sm:$0xf]  ;;  %v3566_v62 = vld [vmem:[#allocation4 + $0xf4] sm:$0xf] }
  0x3c   :  { %v3629_v56 = vld [vmem:[#allocation4 + $0x2ec] sm:$0xf]  ;;  %v2692_v0 = vld [vmem:[#allocation4 + $0xfc] sm:$0xf0]  ;;  %v3602_v1 = vld [vmem:[#allocation4 + $0x214] sm:$0xf] }
  0x3d   :  { %1053 = vmatpush.bf16.msrb.mxu2 %v2823_v48  ;;  %1067 = vmatpush.bf16.msrb.mxu3 %v2919_v49  ;;  %v2608_v48 = vld [vmem:[#allocation4 + $0x54] sm:$0xf0]  ;;  %v2859_v49 = vor.u32 %v3609_v46, %v2858_v44  ;;  %v2947_v59 = vor.u32 %v3629_v56, %v2944_v58  ;;  %v2836_v2 = vld [vmem:[#allocation4 + $0x21c] sm:$0xf0]  ;;  %v2695_v3 = vor.u32 %v3566_v62, %v2692_v0  ;;  %v3626_v5 = vld [vmem:[#allocation4 + $0x2d4] sm:$0xf] }
  0x3e   :  { %1028 = vmatpush.bf16.msrb.mxu0 %v2595_v42  ;;  %1042 = vmatpush.bf16.msrb.mxu1 %v2691_v43  ;;  %v2762_v42 = vld [vmem:[#allocation4 + $0x180] sm:$0xf]  ;;  %v3585_v43 = vld [vmem:[#allocation4 + $0x188] sm:$0xf0]  ;;  %v2611_v50 = vor.u32 %v3545_v47, %v2608_v48  ;;  %v2839_v4 = vor.u32 %v3602_v1, %v2836_v2  ;;  %v3563_v10 = vld [vmem:[#allocation4 + $0xdc] sm:$0xf] }
  0x3f   :  { %v2763_v45 = vor.u32 %v3585_v43, %v2762_v42  ;;  %v2824_v14 = vld [vmem:[#allocation4 + $0x204] sm:$0xf0]  ;;  %v3623_v17 = vld [vmem:[#allocation4 + $0x2bc] sm:$0xf]  ;;  %v3560_v22 = vld [vmem:[#allocation4 + $0xc4] sm:$0xf] }
  0x40   :  { %v2920_v18 = vld [vmem:[#allocation4 + $0x2c4] sm:$0xf0]  ;;  %v2812_v26 = vld [vmem:[#allocation4 + $0x1ec] sm:$0xf0]  ;;  %v3620_v29 = vld [vmem:[#allocation4 + $0x2a4] sm:$0xf] }
  0x41   :  { %1054 = vmatpush.bf16.msrb.mxu2 %v2811_v60  ;;  %1068 = vmatpush.bf16.msrb.mxu3 %v2907_v61  ;;  %v3542_v60 = vld [vmem:[#allocation4 + $0x34] sm:$0xf]  ;;  %v2596_v61 = vld [vmem:[#allocation4 + $0x3c] sm:$0xf0]  ;;  %v2923_v19 = vor.u32 %v3623_v17, %v2920_v18  ;;  %v3587_v44 = vld [vmem:[#allocation4 + $0x19c] sm:$0xf] }
  0x42   :  { %1029 = vmatpush.bf16.msrb.mxu0 %v2583_v54  ;;  %1043 = vmatpush.bf16.msrb.mxu1 %v2679_v55  ;;  %v2707_v54 = vor.u32 %v3569_v51, %v2704_v52  ;;  %v2848_v55 = vld [vmem:[#allocation4 + $0x234] sm:$0xf0]  ;;  %v2599_v63 = vor.u32 %v3542_v60, %v2596_v61  ;;  %v3590_v38 = vld [vmem:[#allocation4 + $0x1b4] sm:$0xf]  ;;  %v2788_v39 = vld [vmem:[#allocation4 + $0x1bc] sm:$0xf0] }
  0x43   :  { %v2851_v57 = vor.u32 %v3605_v53, %v2848_v55  ;;  %v2884_v42 = vld [vmem:[#allocation4 + $0x27c] sm:$0xf0]  ;;  %v3611_v46 = vld [vmem:[#allocation4 + $0x25c] sm:$0xf]  ;;  %v2872_v48 = vld [vmem:[#allocation4 + $0x264] sm:$0xf0] }
  0x44   :  { %2566 = vmatmul.msk.bf16.vlgmr.msra.gmra.mxu2 %vm210_vm1, %v4015_v36  ;;  %2567 = vmatmul.msk.bf16.vlgmr.msra.gmra.mxu3 %vm210_vm1, %v4015_v36  ;;  %v2870_v36 = vld [vmem:[#allocation4 + $0x258] sm:$0xf]  ;;  %v2764_v51 = vld [vmem:[#allocation4 + $0x18c] sm:$0xf0]  ;;  %v3608_v52 = vld [vmem:[#allocation4 + $0x244] sm:$0xf] }
  0x45   :  { %1055 = vmatpush.bf16.msrb.mxu2 %v2799_v12  ;;  %1069 = vmatpush.bf16.msrb.mxu3 %v2895_v13  ;;  %v2871_v35 = vor.u32 %v3612_v30, %v2870_v36  ;;  %v2680_v12 = vld [vmem:[#allocation4 + $0xe4] sm:$0xf0]  ;;  %v3599_v13 = vld [vmem:[#allocation4 + $0x1fc] sm:$0xf]  ;;  %v2908_v36 = vld [vmem:[#allocation4 + $0x2ac] sm:$0xf0] }
  0x46   :  { %1030 = vmatpush.bf16.msrb.mxu0 %v2571_v6  ;;  %1044 = vmatpush.bf16.msrb.mxu1 %v2667_v7  ;;  %v2932_v6 = vld [vmem:[#allocation4 + $0x2dc] sm:$0xf0]  ;;  %v2683_v15 = vor.u32 %v3563_v10, %v2680_v12  ;;  %v2827_v16 = vor.u32 %v3599_v13, %v2824_v14  ;;  %v2911_v30 = vor.u32 %v3620_v29, %v2908_v36  ;;  %v2662_v1 = vld [vmem:[#allocation4 + $0xb0] sm:$0xf]  ;;  %v2650_v13 = vld [vmem:[#allocation4 + $0x98] sm:$0xf] }
  0x47   :  { %v2935_v7 = vor.u32 %v3626_v5, %v2932_v6  ;;  %v4040_v56 = vld [vmem:[%s4165_s2] sm:$0xff]  ;;  %v2758_v5 = vld [vmem:[#allocation4 + $0x170] sm:$0xf]  ;;  %v3583_v6 = vld [vmem:[#allocation4 + $0x178] sm:$0xf0] }
  0x48   :  { %v135_v60 = vperm.slane %v4040_v56, 1  ;;  %v2759_v12 = vor.u32 %v3583_v6, %v2758_v5  ;;  %v2746_v17 = vld [vmem:[#allocation4 + $0x158] sm:$0xf]  ;;  %v3580_v18 = vld [vmem:[#allocation4 + $0x160] sm:$0xf0] }
  0x49   :  { %1056 = vmatpush.bf16.msrb.mxu2 %v2787_v24  ;;  %1070 = vmatpush.bf16.msrb.mxu3 %v2883_v25  ;;  %v2668_v24 = vld [vmem:[#allocation4 + $0xcc] sm:$0xf0]  ;;  %v3596_v25 = vld [vmem:[#allocation4 + $0x1e4] sm:$0xf] }
  0x4a   :  { %1079 = vmatpush.bf16.msra.mxu0 %v2659_v8  ;;  %1093 = vmatpush.bf16.msra.mxu1 %v2755_v9  ;;  %v3539_v8 = vld [vmem:[#allocation4 + $0x1c] sm:$0xf]  ;;  %v2584_v9 = vld [vmem:[#allocation4 + $0x24] sm:$0xf0]  ;;  %v2671_v27 = vor.u32 %v3560_v22, %v2668_v24  ;;  %v2815_v28 = vor.u32 %v3596_v25, %v2812_v26  ;;  %v2747_v22 = vor.u32 %v3580_v18, %v2746_v17  ;;  %v3553_v24 = vld [vmem:[#allocation4 + $0x88] sm:$0xf0] }
  0x4b   :  { %v2587_v11 = vor.u32 %v3539_v8, %v2584_v9  ;;  %v2734_v25 = vld [vmem:[#allocation4 + $0x140] sm:$0xf]  ;;  %v3577_v26 = vld [vmem:[#allocation4 + $0x148] sm:$0xf0]  ;;  %v3628_v5 = vld [vmem:[#allocation4 + $0x2e0] sm:$0xf0] }
  0x4c   :  { %v2735_v36 = vor.u32 %v3577_v26, %v2734_v25  ;;  %v3601_v17 = vld [vmem:[#allocation4 + $0x208] sm:$0xf0]  ;;  %v2926_v18 = vld [vmem:[#allocation4 + $0x2c0] sm:$0xf] }
  0x4d   :  { %1057 = vmatpush.bf16.msrb.mxu2 %v2775_v34  ;;  %1071 = vmatpush.bf16.msrb.mxu3 %v2871_v35  ;;  %v3617_v34 = vld [vmem:[#allocation4 + $0x28c] sm:$0xf]  ;;  %v2896_v35 = vld [vmem:[#allocation4 + $0x294] sm:$0xf0] }
  0x4e   :  { %1080 = vmatpush.bf16.msra.mxu0 %v2647_v20  ;;  %1094 = vmatpush.bf16.msra.mxu1 %v2743_v21  ;;  %v3536_v20 = vld [vmem:[#allocation4 + $0x4] sm:$0xf]  ;;  %v2572_v21 = vld [vmem:[#allocation4 + $0xc] sm:$0xf0]  ;;  %v2899_v37 = vor.u32 %v3617_v34, %v2896_v35 }
  0x4f   :  { %v2575_v23 = vor.u32 %v3536_v20, %v2572_v21 }
  0x51   :  { %1058 = vmatpush.bf16.msrb.mxu2 %v2763_v45  ;;  %1072 = vmatpush.bf16.msrb.mxu3 %v2859_v49  ;;  %v2776_v45 = vld [vmem:[#allocation4 + $0x1a4] sm:$0xf0]  ;;  %v2875_v49 = vor.u32 %v3611_v46, %v2872_v48  ;;  %v3571_v46 = vld [vmem:[#allocation4 + $0x118] sm:$0xf0] }
  0x52   :  { %1081 = vmatpush.bf16.msra.mxu0 %v2635_v31  ;;  %1095 = vmatpush.bf16.msra.mxu1 %v2731_v32  ;;  %v3593_v31 = vld [vmem:[#allocation4 + $0x1cc] sm:$0xf]  ;;  %v2800_v32 = vld [vmem:[#allocation4 + $0x1d4] sm:$0xf0]  ;;  %v2779_v47 = vor.u32 %v3587_v44, %v2776_v45  ;;  %v3547_v44 = vld [vmem:[#allocation4 + $0x58] sm:$0xf0] }
  0x53   :  { %v2803_v33 = vor.u32 %v3593_v31, %v2800_v32  ;;  %v3550_v31 = vld [vmem:[#allocation4 + $0x70] sm:$0xf0]  ;;  %v2722_v32 = vld [vmem:[#allocation4 + $0x128] sm:$0xf]  ;;  %v2710_v45 = vld [vmem:[#allocation4 + $0x110] sm:$0xf] }
  0x54   :  { %v3607_v48 = vld [vmem:[#allocation4 + $0x238] sm:$0xf0] }
  0x55   :  { %1107 = vmatpush.bf16.msra.mxu2 %v2851_v57  ;;  %1121 = vmatpush.bf16.msra.mxu3 %v2947_v59  ;;  %v134_v59 = vperm.slane %v4040_v56, 0 }
  0x56   :  { %1082 = vmatpush.bf16.msra.mxu0 %v2623_v40  ;;  %1096 = vmatpush.bf16.msra.mxu1 %v2719_v41  ;;  %v3614_v40 = vld [vmem:[#allocation4 + $0x274] sm:$0xf]  ;;  %v2791_v41 = vor.u32 %v3590_v38, %v2788_v39 }
  0x57   :  { %v2887_v43 = vor.u32 %v3614_v40, %v2884_v42 }
  0x59   :  { %1108 = vmatpush.bf16.msra.mxu2 %v2839_v4  ;;  %1122 = vmatpush.bf16.msra.mxu3 %v2935_v7  ;;  %v3559_v4 = vld [vmem:[#allocation4 + $0xb8] sm:$0xf0] }
  0x5a   :  { %1083 = vmatpush.bf16.msra.mxu0 %v2611_v50  ;;  %1097 = vmatpush.bf16.msra.mxu1 %v2707_v54  ;;  %v3584_v50 = vld [vmem:[#allocation4 + $0x184] sm:$0xf]  ;;  %v2860_v54 = vld [vmem:[#allocation4 + $0x24c] sm:$0xf0] }
  0x5b   :  { %v2767_v53 = vor.u32 %v3584_v50, %v2764_v51  ;;  %v2863_v55 = vor.u32 %v3608_v52, %v2860_v54  ;;  %v3631_v54 = vld [vmem:[#allocation4 + $0x2f8] sm:$0xf0] }
  0x5d   :  { %1109 = vmatpush.bf16.msra.mxu2 %v2827_v16  ;;  %1123 = vmatpush.bf16.msra.mxu3 %v2923_v19  ;;  %v3556_v16 = vld [vmem:[#allocation4 + $0xa0] sm:$0xf0] }
  0x5e   :  { %1084 = vmatpush.bf16.msra.mxu0 %v2599_v63  ;;  %1098 = vmatpush.bf16.msra.mxu1 %v2695_v3  ;;  %v2651_v21 = vor.u32 %v3556_v16, %v2650_v13  ;;  %v3565_v13 = vld [vmem:[#allocation4 + $0xe8] sm:$0xf0]  ;;  %v2830_v16 = vld [vmem:[#allocation4 + $0x200] sm:$0xf] }
  0x5f   :  { %v2831_v25 = vor.u32 %v3601_v17, %v2830_v16  ;;  %v2770_v17 = vld [vmem:[#allocation4 + $0x188] sm:$0xf] }
  0x61   :  { %1110 = vmatpush.bf16.msra.mxu2 %v2815_v28  ;;  %1124 = vmatpush.bf16.msra.mxu3 %v2911_v30  ;;  %v137_v28 = vperm.slane %v4040_v56, 3  ;;  %v2626_v30 = vld [vmem:[#allocation4 + $0x68] sm:$0xf] }
  0x62   :  { %1085 = vmatpush.bf16.msra.mxu0 %v2587_v11  ;;  %1099 = vmatpush.bf16.msra.mxu1 %v2683_v15  ;;  %v2663_v11 = vor.u32 %v3559_v4, %v2662_v1  ;;  %v2627_v39 = vor.u32 %v3550_v31, %v2626_v30  ;;  %v3568_v1 = vld [vmem:[#allocation4 + $0x100] sm:$0xf0]  ;;  %v2938_v4 = vld [vmem:[#allocation4 + $0x2d8] sm:$0xf]  ;;  %v3622_v30 = vld [vmem:[#allocation4 + $0x2b0] sm:$0xf0] }
  0x63   :  { %v3038_v31 = vld [vmem:[#allocation6 + $0xa8] sm:$0xf] }
  0x65   :  { %1111 = vmatpush.bf16.msra.mxu2 %v2803_v33  ;;  %1125 = vmatpush.bf16.msra.mxu3 %v2899_v37  ;;  %v3574_v33 = vld [vmem:[#allocation4 + $0x130] sm:$0xf0] }
  0x66   :  { %1086 = vmatpush.bf16.msra.mxu0 %v2575_v23  ;;  %1100 = vmatpush.bf16.msra.mxu1 %v2671_v27  ;;  %v2638_v23 = vld [vmem:[#allocation4 + $0x80] sm:$0xf]  ;;  %v136_v27 = vperm.slane %v4040_v56, 2  ;;  %v2723_v40 = vor.u32 %v3574_v33, %v2722_v32  ;;  %v3654_v32 = vld [vmem:[#allocation6 + $0xb0] sm:$0xf0] }
  0x67   :  { %v2639_v29 = vor.u32 %v3553_v24, %v2638_v23  ;;  %v3538_v23 = vld [vmem:[#allocation4 + $0x10] sm:$0xf0]  ;;  %v2674_v24 = vld [vmem:[#allocation4 + $0xc8] sm:$0xf] }
  0x68   :  { %v3134_v33 = vld [vmem:[#allocation6 + $0x168] sm:$0xf] }
  0x69   :  { %1112 = vmatpush.bf16.msra.mxu2 %v2791_v41  ;;  %1126 = vmatpush.bf16.msra.mxu3 %v2887_v43  ;;  %v2614_v41 = vld [vmem:[#allocation4 + $0x50] sm:$0xf] }
  0x6d   :  { %1113 = vmatpush.bf16.msra.mxu2 %v2779_v47  ;;  %1127 = vmatpush.bf16.msra.mxu3 %v2875_v49  ;;  %v2854_v47 = vld [vmem:[#allocation4 + $0x230] sm:$0xf] }
  0x6e   :  { %v2950_v49 = vld [vmem:[#allocation4 + $0x2f0] sm:$0xf] }
  0x71   :  { %1114 = vmatpush.bf16.msra.mxu2 %v2767_v53  ;;  %1128 = vmatpush.bf16.msra.mxu3 %v2863_v55 }
  0xa7   :  { %v248_v57 = vpop.f32.mrf.mxu2  ;;  %v262_v58 = vpop.f32.mrf.mxu3 }
  0xa8   :  { %v249_v61 = vadd.f32 %v248_v57, %v134_v59  ;;  %v263_v62 = vadd.f32 %v262_v58, %v135_v60  ;;  %v2615_v58 = vor.u32 %v3547_v44, %v2614_v41  ;;  %v3595_v41 = vld [vmem:[#allocation4 + $0x1d8] sm:$0xf0]  ;;  %v2902_v44 = vld [vmem:[#allocation4 + $0x290] sm:$0xf] }
  0xaa   :  { %v351_v7 = vmax.f32 %v249_v61, 0.0  ;;  %v352_v8 = vmax.f32 %v263_v62, 0.0  ;;  %v3544_v61 = vld [vmem:[#allocation4 + $0x40] sm:$0xf0]  ;;  %v2855_v62 = vor.u32 %v3607_v48, %v2854_v47  ;;  %v3651_v47 = vld [vmem:[#allocation6 + $0x98] sm:$0xf0] }
  0xab   :  { %v3122_v48 = vld [vmem:[#allocation6 + $0x150] sm:$0xf] }
  0xaf   :  { %v250_v63 = vpop.f32.mrf.mxu2  ;;  %v264_v0 = vpop.f32.mrf.mxu3 }
  0xb0   :  { %v251_v2 = vadd.f32 %v250_v63, %v134_v59  ;;  %v265_v3 = vadd.f32 %v264_v0, %v135_v60  ;;  %v2711_v59 = vor.u32 %v3571_v46, %v2710_v45  ;;  %v2602_v60 = vld [vmem:[#allocation4 + $0x38] sm:$0xf]  ;;  %v2951_v63 = vor.u32 %v3631_v54, %v2950_v49  ;;  %v3619_v45 = vld [vmem:[#allocation4 + $0x298] sm:$0xf0]  ;;  %v3026_v46 = vld [vmem:[#allocation6 + $0x90] sm:$0xf] }
  0xb1   :  { %v2698_v0 = vld [vmem:[#allocation4 + $0xf8] sm:$0xf]  ;;  %v2603_v6 = vor.u32 %v3544_v61, %v2602_v60  ;;  %v3675_v49 = vld [vmem:[#allocation6 + $0x158] sm:$0xf0]  ;;  %v3027_v54 = vor.u32 %v3651_v47, %v3026_v46  ;;  %v3616_v60 = vld [vmem:[#allocation4 + $0x280] sm:$0xf0] }
  0xb2   :  { %v359_v9 = vmax.f32 %v251_v2, 0.0  ;;  %v360_v10 = vmax.f32 %v265_v3, 0.0  ;;  %v2842_v2 = vld [vmem:[#allocation4 + $0x218] sm:$0xf]  ;;  %v3604_v3 = vld [vmem:[#allocation4 + $0x220] sm:$0xf0] }
  0xb3   :  { %v3014_v61 = vld [vmem:[#allocation6 + $0x78] sm:$0xf]  ;;  %v139_v46 = vperm.slane %v4040_v56, 5 }
  0xb4   :  { %v4044_v14 = vpack.c.bf16 %v359_v9, %v351_v7  ;;  %v4046_v15 = vpack.c.bf16 %v360_v10, %v352_v8  ;;  %v2699_v7 = vor.u32 %v3568_v1, %v2698_v0  ;;  %v2590_v8 = vld [vmem:[#allocation4 + $0x20] sm:$0xf]  ;;  %v3541_v9 = vld [vmem:[#allocation4 + $0x28] sm:$0xf0]  ;;  %v2843_v10 = vor.u32 %v3604_v3, %v2842_v2  ;;  %v3672_v0 = vld [vmem:[#allocation6 + $0x140] sm:$0xf0] }
  0xb5   :  { %v2782_v3 = vld [vmem:[#allocation4 + $0x1a0] sm:$0xf] }
  0xb6   :  { %1031 = vmatmul.bf16.vlgmr.msrb.gmra.mxu0 %v4044_v14  ;;  %1045 = vmatmul.bf16.vlgmr.msrb.gmra.mxu1 %v4046_v15 }
  0xb7   :  { %1135 = vmatpush.bf16.msrb.mxu0 %v2663_v11  ;;  %1149 = vmatpush.bf16.msrb.mxu1 %v2759_v12  ;;  %v276_v19 = vpop.f32.mrf.mxu2  ;;  %v290_v20 = vpop.f32.mrf.mxu3  ;;  %v2939_v11 = vor.u32 %v3628_v5, %v2938_v4  ;;  %v2686_v12 = vld [vmem:[#allocation4 + $0xe0] sm:$0xf]  ;;  %v3589_v4 = vld [vmem:[#allocation4 + $0x1a8] sm:$0xf0] }
  0xb8   :  { %v277_v34 = vadd.f32 %v276_v19, %v136_v27  ;;  %v291_v35 = vadd.f32 %v290_v20, %v137_v28  ;;  %v3625_v19 = vld [vmem:[#allocation4 + $0x2c8] sm:$0xf0]  ;;  %v2591_v20 = vor.u32 %v3541_v9, %v2590_v8  ;;  %v3002_v9 = vld [vmem:[#allocation6 + $0x60] sm:$0xf] }
  0xb9   :  { %v2927_v26 = vor.u32 %v3625_v19, %v2926_v18  ;;  %v3613_v8 = vld [vmem:[#allocation4 + $0x268] sm:$0xf0]  ;;  %v3586_v18 = vld [vmem:[#allocation4 + $0x190] sm:$0xf0]  ;;  %v2866_v19 = vld [vmem:[#allocation4 + $0x248] sm:$0xf] }
  0xba   :  { %v353_v50 = vmax.f32 %v277_v34, 0.0  ;;  %v354_v51 = vmax.f32 %v291_v35, 0.0  ;;  %v3678_v34 = vld [vmem:[#allocation6 + $0x170] sm:$0xf0] }
  0xbb   :  { %1136 = vmatpush.bf16.msrb.mxu0 %v2651_v21  ;;  %1150 = vmatpush.bf16.msrb.mxu1 %v2747_v22  ;;  %v2687_v21 = vor.u32 %v3565_v13, %v2686_v12  ;;  %v2578_v22 = vld [vmem:[#allocation4 + $0x8] sm:$0xf]  ;;  %v3669_v12 = vld [vmem:[#allocation6 + $0x128] sm:$0xf0]  ;;  %v4064_v13 = vpop.f32.mrf.mxu0 }
  0xbc   :  { %v2579_v35 = vor.u32 %v3538_v23, %v2578_v22  ;;  %v3610_v22 = vld [vmem:[#allocation4 + $0x250] sm:$0xf0]  ;;  %v2990_v23 = vld [vmem:[#allocation6 + $0x48] sm:$0xf] }
  0xbf   :  { %1137 = vmatpush.bf16.msrb.mxu0 %v2639_v29  ;;  %1151 = vmatpush.bf16.msrb.mxu1 %v2735_v36  ;;  %v278_v37 = vpop.f32.mrf.mxu2  ;;  %v292_v38 = vpop.f32.mrf.mxu3  ;;  %v3598_v29 = vld [vmem:[#allocation4 + $0x1f0] sm:$0xf0]  ;;  %v2914_v36 = vld [vmem:[#allocation4 + $0x2a8] sm:$0xf] }
  0xc0   :  { %v279_v42 = vadd.f32 %v278_v37, %v136_v27  ;;  %v293_v43 = vadd.f32 %v292_v38, %v137_v28  ;;  %v3562_v27 = vld [vmem:[#allocation4 + $0xd0] sm:$0xf0]  ;;  %v2818_v28 = vld [vmem:[#allocation4 + $0x1e8] sm:$0xf] }
  0xc1   :  { %v2675_v37 = vor.u32 %v3562_v27, %v2674_v24  ;;  %v2819_v38 = vor.u32 %v3598_v29, %v2818_v28  ;;  %v3642_v24 = vld [vmem:[#allocation6 + $0x50] sm:$0xf0]  ;;  %v3230_v27 = vld [vmem:[#allocation6 + $0x228] sm:$0xf] }
  0xc2   :  { %v361_v52 = vmax.f32 %v279_v42, 0.0  ;;  %v362_v53 = vmax.f32 %v293_v43, 0.0  ;;  %v3039_v42 = vor.u32 %v3654_v32, %v3038_v31  ;;  %v3135_v43 = vor.u32 %v3678_v34, %v3134_v33  ;;  %v3702_v28 = vld [vmem:[#allocation6 + $0x230] sm:$0xf0]  ;;  %v3326_v29 = vld [vmem:[#allocation6 + $0x2e8] sm:$0xf] }
  0xc3   :  { %1138 = vmatpush.bf16.msrb.mxu0 %v2627_v39  ;;  %1152 = vmatpush.bf16.msrb.mxu1 %v2723_v40  ;;  %v2915_v39 = vor.u32 %v3622_v30, %v2914_v36  ;;  %v2806_v40 = vld [vmem:[#allocation4 + $0x1d0] sm:$0xf]  ;;  %v3726_v36 = vld [vmem:[#allocation6 + $0x2f0] sm:$0xf0]  ;;  %v2771_v30 = vor.u32 %v3586_v18, %v2770_v17  ;;  %v2867_v31 = vor.u32 %v3610_v22, %v2866_v19  ;;  %v3677_v17 = vld [vmem:[#allocation6 + $0x16c] sm:$0xf] }
  0xc4   :  { %v4052_v55 = vpack.c.bf16 %v361_v52, %v353_v50  ;;  %v4054_v57 = vpack.c.bf16 %v362_v53, %v354_v51  ;;  %v2807_v50 = vor.u32 %v3595_v41, %v2806_v40  ;;  %v2903_v51 = vor.u32 %v3619_v45, %v2902_v44  ;;  %v2794_v52 = vld [vmem:[#allocation4 + $0x1b8] sm:$0xf]  ;;  %v3592_v53 = vld [vmem:[#allocation4 + $0x1c0] sm:$0xf0]  ;;  %v2978_v34 = vld [vmem:[#allocation6 + $0x30] sm:$0xf] }
  0xc5   :  { %v2795_v1 = vor.u32 %v3592_v53, %v2794_v52  ;;  %v2991_v32 = vor.u32 %v3642_v24, %v2990_v23  ;;  %v3663_v40 = vld [vmem:[#allocation6 + $0xf8] sm:$0xf0]  ;;  %v3218_v41 = vld [vmem:[#allocation6 + $0x210] sm:$0xf]  ;;  %v138_v45 = vperm.slane %v4040_v56, 4 }
  0xc6   :  { %1059 = vmatmul.bf16.vlgmr.msrb.gmra.mxu2 %v4052_v55  ;;  %1073 = vmatmul.bf16.vlgmr.msrb.gmra.mxu3 %v4054_v57  ;;  %v3723_v44 = vld [vmem:[#allocation6 + $0x2d8] sm:$0xf0] }
  0xc7   :  { %1087 = vmatmul.bf16.vlgmr.msra.gmra.mxu0 %v4044_v14  ;;  %1101 = vmatmul.bf16.vlgmr.msra.gmra.mxu1 %v4046_v15  ;;  %v346_v18 = vpop.f32.mrf.mxu3 }
  0xc8   :  { %1139 = vmatpush.bf16.msrb.mxu0 %v2615_v58  ;;  %1153 = vmatpush.bf16.msrb.mxu1 %v2711_v59  ;;  %v3123_v58 = vor.u32 %v3675_v49, %v3122_v48  ;;  %v2890_v59 = vld [vmem:[#allocation4 + $0x278] sm:$0xf] }
  0xc9   :  { %1163 = vmatpush.bf16.msrb.mxu2 %v2855_v62  ;;  %1177 = vmatpush.bf16.msrb.mxu3 %v2951_v63  ;;  %v3648_v62 = vld [vmem:[#allocation6 + $0x80] sm:$0xf0]  ;;  %v3110_v63 = vld [vmem:[#allocation6 + $0x138] sm:$0xf]  ;;  %v2891_v2 = vor.u32 %v3616_v60, %v2890_v59 }
  0xca   :  { %v3015_v5 = vor.u32 %v3648_v62, %v3014_v61  ;;  %v2966_v49 = vld [vmem:[#allocation6 + $0x18] sm:$0xf]  ;;  %v3660_v59 = vld [vmem:[#allocation6 + $0xe0] sm:$0xf0] }
  0xcb   :  { %v3206_v60 = vld [vmem:[#allocation6 + $0x1f8] sm:$0xf]  ;;  %v3696_v61 = vld [vmem:[#allocation6 + $0x200] sm:$0xf0] }
  0xcc   :  { %1140 = vmatpush.bf16.msrb.mxu0 %v2603_v6  ;;  %1154 = vmatpush.bf16.msrb.mxu1 %v2699_v7  ;;  %v3111_v6 = vor.u32 %v3672_v0, %v3110_v63  ;;  %v2878_v7 = vld [vmem:[#allocation4 + $0x260] sm:$0xf]  ;;  %v3302_v62 = vld [vmem:[#allocation6 + $0x2b8] sm:$0xf]  ;;  %v3720_v63 = vld [vmem:[#allocation6 + $0x2c0] sm:$0xf0] }
  0xcd   :  { %1164 = vmatpush.bf16.msrb.mxu2 %v2843_v10  ;;  %1178 = vmatpush.bf16.msrb.mxu3 %v2939_v11  ;;  %v3645_v10 = vld [vmem:[#allocation6 + $0x68] sm:$0xf0]  ;;  %v3098_v11 = vld [vmem:[#allocation6 + $0x120] sm:$0xf]  ;;  %v2879_v16 = vor.u32 %v3613_v8, %v2878_v7 }
  0xce   :  { %v2954_v0 = vld [vmem:[#allocation6] sm:$0xf] }
  0xcf   :  { %v3050_v8 = vld [vmem:[#allocation6 + $0xc0] sm:$0xf] }
  0xd0   :  { %1141 = vmatpush.bf16.msrb.mxu0 %v2591_v20  ;;  %1155 = vmatpush.bf16.msrb.mxu1 %v2687_v21  ;;  %v3003_v20 = vor.u32 %v3645_v10, %v3002_v9  ;;  %v3099_v21 = vor.u32 %v3669_v12, %v3098_v11  ;;  %v3657_v9 = vld [vmem:[#allocation6 + $0xc8] sm:$0xf0]  ;;  %v3303_v10 = vor.u32 %v3720_v63, %v3302_v62  ;;  %v3290_v12 = vld [vmem:[#allocation6 + $0x2a0] sm:$0xf]  ;;  %v3158_v62 = vld [vmem:[#allocation6 + $0x198] sm:$0xf] }
  0xd1   :  { %1165 = vmatpush.bf16.msrb.mxu2 %v2831_v25  ;;  %1179 = vmatpush.bf16.msrb.mxu3 %v2927_v26  ;;  %v3086_v25 = vld [vmem:[#allocation6 + $0x108] sm:$0xf]  ;;  %v3666_v26 = vld [vmem:[#allocation6 + $0x110] sm:$0xf0]  ;;  %v3693_v11 = vld [vmem:[#allocation6 + $0x1e8] sm:$0xf0] }
  0xd2   :  { %v3087_v33 = vor.u32 %v3666_v26, %v3086_v25  ;;  %v3051_v25 = vor.u32 %v3657_v9, %v3050_v8  ;;  %v3684_v63 = vld [vmem:[#allocation6 + $0x1a0] sm:$0xf0]  ;;  %v3100_v8 = vld [vmem:[#allocation6 + $0x12c] sm:$0xf0] }
  0xd4   :  { %1142 = vmatpush.bf16.msrb.mxu0 %v2579_v35  ;;  %1156 = vmatpush.bf16.msrb.mxu1 %v2675_v37  ;;  %v3639_v35 = vld [vmem:[#allocation6 + $0x38] sm:$0xf0]  ;;  %v3231_v37 = vor.u32 %v3702_v28, %v3230_v27  ;;  %v3182_v28 = vld [vmem:[#allocation6 + $0x1c8] sm:$0xf] }
  0xd5   :  { %1166 = vmatpush.bf16.msrb.mxu2 %v2819_v38  ;;  %1180 = vmatpush.bf16.msrb.mxu3 %v2915_v39  ;;  %v3327_v38 = vor.u32 %v3726_v36, %v3326_v29  ;;  %v3074_v39 = vld [vmem:[#allocation6 + $0xf0] sm:$0xf]  ;;  %v2979_v47 = vor.u32 %v3639_v35, %v2978_v34  ;;  %v3690_v29 = vld [vmem:[#allocation6 + $0x1d0] sm:$0xf0]  ;;  %v3028_v34 = vld [vmem:[#allocation6 + $0x9c] sm:$0xf0] }
  0xd6   :  { %1115 = vmatmul.bf16.vlgmr.msra.gmra.mxu2 %v4052_v55  ;;  %1129 = vmatmul.bf16.vlgmr.msra.gmra.mxu3 %v4054_v57  ;;  %v3075_v48 = vor.u32 %v3663_v40, %v3074_v39  ;;  %v3674_v35 = vld [vmem:[#allocation6 + $0x154] sm:$0xf]  ;;  %v140_v40 = vperm.slane %v4040_v56, 6 }
  0xd7   :  { %1143 = vmatmul.bf16.vlgmr.msrb.gmra.mxu0 %v4044_v14  ;;  %1157 = vmatmul.bf16.vlgmr.msrb.gmra.mxu1 %v4046_v15  ;;  %v4066_v14 = vpop.f32.mrf.mxu1  ;;  %v2783_v15 = vor.u32 %v3589_v4, %v2782_v3 }
  0xd8   :  { %1845 = vmatpush.bf16.msra.mxu0 %v3039_v42  ;;  %1859 = vmatpush.bf16.msra.mxu1 %v3135_v43  ;;  %v3699_v42 = vld [vmem:[#allocation6 + $0x218] sm:$0xf0]  ;;  %v3314_v43 = vld [vmem:[#allocation6 + $0x2d0] sm:$0xf]  ;;  %v319_v3 = vadd.f32 %v4066_v14, %v139_v46  ;;  %v332_v14 = vpop.f32.mrf.mxu2 }
  0xd9   :  { %1167 = vmatpush.bf16.msrb.mxu2 %v2807_v50  ;;  %1181 = vmatpush.bf16.msrb.mxu3 %v2903_v51  ;;  %v3636_v50 = vld [vmem:[#allocation6 + $0x20] sm:$0xf0]  ;;  %v306_v51 = vpop.f32.mrf.mxu0  ;;  %v3219_v53 = vor.u32 %v3699_v42, %v3218_v41  ;;  %v141_v41 = vperm.slane %v4040_v56, 7  ;;  %v3183_v42 = vor.u32 %v3690_v29, %v3182_v28  ;;  %v333_v56 = vadd.f32 %v332_v14, %v140_v40 }
  0xda   :  { %v307_v4 = vadd.f32 %v306_v51, %v138_v45  ;;  %v3016_v51 = vld [vmem:[#allocation6 + $0x84] sm:$0xf0] }
  0xdc   :  { %1846 = vmatpush.bf16.msra.mxu0 %v3027_v54  ;;  %1860 = vmatpush.bf16.msra.mxu1 %v3123_v58  ;;  %v3315_v54 = vor.u32 %v3723_v44, %v3314_v43  ;;  %v3062_v58 = vld [vmem:[#allocation6 + $0xd8] sm:$0xf]  ;;  %v363_v22 = vmax.f32 %v307_v4, 0.0  ;;  %v3170_v44 = vld [vmem:[#allocation6 + $0x1b0] sm:$0xf] }
  0xdd   :  { %1168 = vmatpush.bf16.msrb.mxu2 %v2795_v1  ;;  %1182 = vmatpush.bf16.msrb.mxu3 %v2891_v2  ;;  %v3633_v1 = vld [vmem:[#allocation6 + $0x8] sm:$0xf0]  ;;  %v305_v2 = vadd.f32 %v4064_v13, %v138_v45  ;;  %v3063_v7 = vor.u32 %v3660_v59, %v3062_v58  ;;  %v3040_v13 = vld [vmem:[#allocation6 + $0xb4] sm:$0xf0]  ;;  %v3687_v45 = vld [vmem:[#allocation6 + $0x1b8] sm:$0xf0]  ;;  %v348_v59 = vpop.f32.mrf.mxu3 }
  0xde   :  { %v2955_v24 = vor.u32 %v3633_v1, %v2954_v0  ;;  %v3644_v4 = vld [vmem:[#allocation6 + $0x64] sm:$0xf]  ;;  %v349_v9 = vadd.f32 %v348_v59, %v141_v41  ;;  %v3304_v59 = vld [vmem:[#allocation6 + $0x2c4] sm:$0xf0] }
  0xdf   :  { %v320_v52 = vpop.f32.mrf.mxu1  ;;  %v355_v19 = vmax.f32 %v305_v2, 0.0  ;;  %v3254_v2 = vld [vmem:[#allocation6 + $0x258] sm:$0xf] }
  0xe0   :  { %1847 = vmatpush.bf16.msra.mxu0 %v3015_v5  ;;  %1861 = vmatpush.bf16.msra.mxu1 %v3111_v6  ;;  %v321_v5 = vadd.f32 %v320_v52, %v139_v46  ;;  %v2967_v6 = vor.u32 %v3636_v50, %v2966_v49  ;;  %v3711_v49 = vld [vmem:[#allocation6 + $0x278] sm:$0xf0]  ;;  %v334_v58 = vpop.f32.mrf.mxu2 }
  0xe1   :  { %1169 = vmatpush.bf16.msrb.mxu2 %v2783_v15  ;;  %1183 = vmatpush.bf16.msrb.mxu3 %v2879_v16  ;;  %v3717_v15 = vld [vmem:[#allocation6 + $0x2a8] sm:$0xf0]  ;;  %v3647_v50 = vld [vmem:[#allocation6 + $0x7c] sm:$0xf] }
  0xe2   :  { %v3653_v16 = vld [vmem:[#allocation6 + $0xac] sm:$0xf]  ;;  %v364_v23 = vmax.f32 %v321_v5, 0.0  ;;  %v3291_v27 = vor.u32 %v3717_v15, %v3290_v12  ;;  %v3671_v52 = vld [vmem:[#allocation6 + $0x13c] sm:$0xf]  ;;  %v3019_v0 = vor.u32 %v3647_v50, %v3016_v51  ;;  %v335_v5 = vadd.f32 %v334_v58, %v140_v40 }
  0xe3   :  { %v3043_v36 = vor.u32 %v3653_v16, %v3040_v13  ;;  %v3681_v15 = vld [vmem:[#allocation6 + $0x188] sm:$0xf0]  ;;  %v3242_v16 = vld [vmem:[#allocation6 + $0x240] sm:$0xf]  ;;  %v3698_v40 = vld [vmem:[#allocation6 + $0x214] sm:$0xf] }
  0xe4   :  { %1848 = vmatpush.bf16.msra.mxu0 %v3003_v20  ;;  %1862 = vmatpush.bf16.msra.mxu1 %v3099_v21  ;;  %v3136_v20 = vld [vmem:[#allocation6 + $0x174] sm:$0xf0]  ;;  %v356_v21 = vmax.f32 %v319_v3, 0.0  ;;  %v3708_v3 = vld [vmem:[#allocation6 + $0x260] sm:$0xf0] }
  0xe5   :  { %1170 = vmatpush.bf16.msrb.mxu2 %v2771_v30  ;;  %1184 = vmatpush.bf16.msrb.mxu3 %v2867_v31  ;;  %v3139_v30 = vor.u32 %v3677_v17, %v3136_v20  ;;  %v3278_v31 = vld [vmem:[#allocation6 + $0x288] sm:$0xf]  ;;  %v3255_v12 = vor.u32 %v3708_v3, %v3254_v2  ;;  %v3705_v13 = vld [vmem:[#allocation6 + $0x248] sm:$0xf0]  ;;  %v3719_v58 = vld [vmem:[#allocation6 + $0x2bc] sm:$0xf] }
  0xe6   :  { %v4076_v39 = vpack.c.bf16 %v364_v23, %v356_v21  ;;  %v3665_v20 = vld [vmem:[#allocation6 + $0x10c] sm:$0xf]  ;;  %v365_v21 = vmax.f32 %v335_v5, 0.0  ;;  %v3088_v23 = vld [vmem:[#allocation6 + $0x114] sm:$0xf0]  ;;  %v3243_v29 = vor.u32 %v3705_v13, %v3242_v16  ;;  %v3307_v2 = vor.u32 %v3719_v58, %v3304_v59 }
  0xe7   :  { %v3052_v3 = vld [vmem:[#allocation6 + $0xcc] sm:$0xf0]  ;;  %v3689_v16 = vld [vmem:[#allocation6 + $0x1cc] sm:$0xf]  ;;  %v3184_v13 = vld [vmem:[#allocation6 + $0x1d4] sm:$0xf0] }
  0xe8   :  { %1849 = vmatpush.bf16.msra.mxu0 %v2991_v32  ;;  %1863 = vmatpush.bf16.msra.mxu1 %v3087_v33  ;;  %v3714_v32 = vld [vmem:[#allocation6 + $0x290] sm:$0xf0]  ;;  %v3196_v5 = vld [vmem:[#allocation6 + $0x1ec] sm:$0xf0]  ;;  %v3704_v58 = vld [vmem:[#allocation6 + $0x244] sm:$0xf] }
  0xe9   :  { %1873 = vmatpush.bf16.msra.mxu2 %v3231_v37  ;;  %1887 = vmatpush.bf16.msra.mxu3 %v3327_v38  ;;  %v3650_v33 = vld [vmem:[#allocation6 + $0x94] sm:$0xf]  ;;  %v3124_v37 = vld [vmem:[#allocation6 + $0x15c] sm:$0xf0]  ;;  %v4074_v38 = vpack.c.bf16 %v363_v22, %v355_v19  ;;  %v3279_v43 = vor.u32 %v3714_v32, %v3278_v31  ;;  %v2992_v19 = vld [vmem:[#allocation6 + $0x54] sm:$0xf0] }
  0xea   :  { %1171 = vmatmul.bf16.vlgmr.msrb.gmra.mxu2 %v4052_v55  ;;  %1185 = vmatmul.bf16.vlgmr.msrb.gmra.mxu3 %v4054_v57  ;;  %v3194_v55 = vld [vmem:[#allocation6 + $0x1e0] sm:$0xf]  ;;  %v3207_v57 = vor.u32 %v3696_v61, %v3206_v60  ;;  %v3031_v46 = vor.u32 %v3650_v33, %v3028_v34  ;;  %v3171_v60 = vor.u32 %v3687_v45, %v3170_v44  ;;  %v366_v22 = vmax.f32 %v349_v9, 0.0  ;;  %v3638_v31 = vld [vmem:[#allocation6 + $0x34] sm:$0xf] }
  0xeb   :  { %v3195_v26 = vor.u32 %v3693_v11, %v3194_v55  ;;  %v357_v55 = vmax.f32 %v333_v56, 0.0  ;;  %v3159_v11 = vor.u32 %v3684_v63, %v3158_v62  ;;  %v2980_v32 = vld [vmem:[#allocation6 + $0x3c] sm:$0xf0]  ;;  %v3722_v44 = vld [vmem:[#allocation6 + $0x2d4] sm:$0xf] }
  0xec   :  { %1850 = vmatpush.bf16.msra.mxu0 %v2979_v47  ;;  %1864 = vmatpush.bf16.msra.mxu1 %v3075_v48  ;;  %v3127_v47 = vor.u32 %v3674_v35, %v3124_v37  ;;  %v3266_v48 = vld [vmem:[#allocation6 + $0x270] sm:$0xf]  ;;  %v3662_v35 = vld [vmem:[#allocation6 + $0xf4] sm:$0xf]  ;;  %v3076_v37 = vld [vmem:[#allocation6 + $0xfc] sm:$0xf0] }
  0xed   :  { %1874 = vmatpush.bf16.msra.mxu2 %v3219_v53  ;;  %1888 = vmatpush.bf16.msra.mxu3 %v3315_v54  ;;  %v3112_v53 = vld [vmem:[#allocation6 + $0x144] sm:$0xf0]  ;;  %v347_v54 = vadd.f32 %v346_v18, %v141_v41  ;;  %v3267_v61 = vor.u32 %v3711_v49, %v3266_v48  ;;  %v3641_v18 = vld [vmem:[#allocation6 + $0x4c] sm:$0xf]  ;;  %v4082_v41 = vpack.c.bf16 %v365_v21, %v357_v55  ;;  %v3316_v45 = vld [vmem:[#allocation6 + $0x2dc] sm:$0xf0] }
  0xee   :  { %v3115_v1 = vor.u32 %v3671_v52, %v3112_v53  ;;  %v3635_v48 = vld [vmem:[#allocation6 + $0x1c] sm:$0xf]  ;;  %v2968_v49 = vld [vmem:[#allocation6 + $0x24] sm:$0xf0]  ;;  %v3319_v51 = vor.u32 %v3722_v44, %v3316_v45  ;;  %v3632_v62 = vld [vmem:[#allocation6 + $0x4] sm:$0xf] }
  0xef   :  { %v3659_v52 = vld [vmem:[#allocation6 + $0xdc] sm:$0xf]  ;;  %v3064_v53 = vld [vmem:[#allocation6 + $0xe4] sm:$0xf0]  ;;  %v2956_v63 = vld [vmem:[#allocation6 + $0xc] sm:$0xf0] }
  0xf0   :  { %1851 = vmatpush.bf16.msra.mxu0 %v2967_v6  ;;  %1865 = vmatpush.bf16.msra.mxu1 %v3063_v7  ;;  %v3004_v6 = vld [vmem:[#allocation6 + $0x6c] sm:$0xf0]  ;;  %v3668_v7 = vld [vmem:[#allocation6 + $0x124] sm:$0xf]  ;;  %v3695_v56 = vld [vmem:[#allocation6 + $0x1fc] sm:$0xf] }
  0xf1   :  { %1875 = vmatpush.bf16.msra.mxu2 %v3207_v57  ;;  %1889 = vmatpush.bf16.msra.mxu3 %v3303_v10  ;;  %v358_v57 = vmax.f32 %v347_v54, 0.0  ;;  %v3146_v10 = vld [vmem:[#allocation6 + $0x180] sm:$0xf]  ;;  %v3007_v17 = vor.u32 %v3644_v4, %v3004_v6  ;;  %v3103_v14 = vor.u32 %v3668_v7, %v3100_v8  ;;  %v3208_v54 = vld [vmem:[#allocation6 + $0x204] sm:$0xf0] }
  0xf2   :  { %v3147_v28 = vor.u32 %v3681_v15, %v3146_v10  ;;  %v3692_v4 = vld [vmem:[#allocation6 + $0x1e4] sm:$0xf]  ;;  %v3292_v7 = vld [vmem:[#allocation6 + $0x2ac] sm:$0xf0]  ;;  %v3655_v9 = vld [vmem:[#allocation6 + $0xb8] sm:$0xf0]  ;;  %v2959_v10 = vor.u32 %v3632_v62, %v2956_v63 }
  0xf3   :  { %v3716_v6 = vld [vmem:[#allocation6 + $0x2a4] sm:$0xf]  ;;  %v3046_v8 = vld [vmem:[#allocation6 + $0xb0] sm:$0xf]  ;;  %v3643_v63 = vld [vmem:[#allocation6 + $0x58] sm:$0xf0] }
  0xf4   :  { %1852 = vmatpush.bf16.msra.mxu0 %v2955_v24  ;;  %1866 = vmatpush.bf16.msra.mxu1 %v3051_v25  ;;  %v3701_v24 = vld [vmem:[#allocation6 + $0x22c] sm:$0xf]  ;;  %v3232_v25 = vld [vmem:[#allocation6 + $0x234] sm:$0xf0]  ;;  %v3142_v55 = vld [vmem:[#allocation6 + $0x170] sm:$0xf]  ;;  %v3295_v15 = vor.u32 %v3716_v6, %v3292_v7 }
  0xf5   :  { %1876 = vmatpush.bf16.msra.mxu2 %v3195_v26  ;;  %1890 = vmatpush.bf16.msra.mxu3 %v3291_v27  ;;  %v3725_v26 = vld [vmem:[#allocation6 + $0x2ec] sm:$0xf]  ;;  %v3328_v27 = vld [vmem:[#allocation6 + $0x2f4] sm:$0xf0]  ;;  %v3235_v33 = vor.u32 %v3701_v24, %v3232_v25  ;;  %v3652_v21 = vld [vmem:[#allocation6 + $0xa0] sm:$0xf0]  ;;  %v3187_v24 = vor.u32 %v3689_v16, %v3184_v13 }
  0xf6   :  { %v3331_v34 = vor.u32 %v3725_v26, %v3328_v27  ;;  %v3686_v26 = vld [vmem:[#allocation6 + $0x1b4] sm:$0xf]  ;;  %v3172_v27 = vld [vmem:[#allocation6 + $0x1bc] sm:$0xf0]  ;;  %v2998_v62 = vld [vmem:[#allocation6 + $0x50] sm:$0xf] }
  0xf7   :  { %1853 = vmatmul.bf16.vlgmr.msra.gmra.mxu0 %v4074_v38  ;;  %1867 = vmatmul.bf16.vlgmr.msra.gmra.mxu1 %v4076_v39  ;;  %v3226_v16 = vld [vmem:[#allocation6 + $0x218] sm:$0xf]  ;;  %v3700_v13 = vld [vmem:[#allocation6 + $0x220] sm:$0xf0] }
  0xf8   :  { %1901 = vmatpush.bf16.msrb.mxu0 %v3043_v36  ;;  %1915 = vmatpush.bf16.msrb.mxu1 %v3139_v30  ;;  %v2995_v36 = vor.u32 %v3641_v18, %v2992_v19  ;;  %v3091_v30 = vor.u32 %v3665_v20, %v3088_v23  ;;  %v3713_v18 = vld [vmem:[#allocation6 + $0x28c] sm:$0xf]  ;;  %v3280_v19 = vld [vmem:[#allocation6 + $0x294] sm:$0xf0]  ;;  %v3676_v23 = vld [vmem:[#allocation6 + $0x160] sm:$0xf0] }
  0xf9   :  { %1877 = vmatpush.bf16.msra.mxu2 %v3183_v42  ;;  %1891 = vmatpush.bf16.msra.mxu3 %v3279_v43  ;;  %v4084_v42 = vpack.c.bf16 %v366_v22, %v358_v57  ;;  %v3220_v43 = vld [vmem:[#allocation6 + $0x21c] sm:$0xf0]  ;;  %v3679_v57 = vld [vmem:[#allocation6 + $0x178] sm:$0xf0]  ;;  %v3034_v20 = vld [vmem:[#allocation6 + $0x98] sm:$0xf]  ;;  %v3283_v25 = vor.u32 %v3713_v18, %v3280_v19 }
  0xfa   :  { %v3223_v50 = vor.u32 %v3698_v40, %v3220_v43  ;;  %v3130_v22 = vld [vmem:[#allocation6 + $0x158] sm:$0xf]  ;;  %v3683_v40 = vld [vmem:[#allocation6 + $0x19c] sm:$0xf]  ;;  %v3160_v43 = vld [vmem:[#allocation6 + $0x1a4] sm:$0xf0] }
  0xfc   :  { %1902 = vmatpush.bf16.msrb.mxu0 %v3031_v46  ;;  %1916 = vmatpush.bf16.msrb.mxu1 %v3127_v47  ;;  %v2983_v46 = vor.u32 %v3638_v31, %v2980_v32  ;;  %v3079_v47 = vor.u32 %v3662_v35, %v3076_v37  ;;  %v3022_v31 = vld [vmem:[#allocation6 + $0x80] sm:$0xf]  ;;  %v3649_v32 = vld [vmem:[#allocation6 + $0x88] sm:$0xf0]  ;;  %v3175_v35 = vor.u32 %v3686_v26, %v3172_v27 }
  0xfd   :  { %1878 = vmatpush.bf16.msra.mxu2 %v3171_v60  ;;  %1892 = vmatpush.bf16.msra.mxu3 %v3267_v61  ;;  %v2971_v60 = vor.u32 %v3635_v48, %v2968_v49  ;;  %v3067_v61 = vor.u32 %v3659_v52, %v3064_v53  ;;  %v3023_v44 = vor.u32 %v3649_v32, %v3022_v31  ;;  %v3010_v48 = vld [vmem:[#allocation6 + $0x68] sm:$0xf]  ;;  %v3646_v49 = vld [vmem:[#allocation6 + $0x70] sm:$0xf0]  ;;  %v3214_v26 = vld [vmem:[#allocation6 + $0x200] sm:$0xf] }
  0xfe   :  { %v3163_v52 = vor.u32 %v3683_v40, %v3160_v43  ;;  %v3011_v59 = vor.u32 %v3646_v49, %v3010_v48  ;;  %v3697_v27 = vld [vmem:[#allocation6 + $0x208] sm:$0xf0]  ;;  %v2962_v31 = vld [vmem:[#allocation6 + $0x8] sm:$0xf]  ;;  %v3634_v32 = vld [vmem:[#allocation6 + $0x10] sm:$0xf0] }
  0xff   :  { %v3202_v40 = vld [vmem:[#allocation6 + $0x1e8] sm:$0xf]  ;;  %v3694_v43 = vld [vmem:[#allocation6 + $0x1f0] sm:$0xf0] }
 0x100   :  { %1903 = vmatpush.bf16.msrb.mxu0 %v3019_v0  ;;  %1917 = vmatpush.bf16.msrb.mxu1 %v3115_v1  ;;  %v3656_v0 = vld [vmem:[#allocation6 + $0xc4] sm:$0xf]  ;;  %v3211_v1 = vor.u32 %v3695_v56, %v3208_v54  ;;  %v3148_v54 = vld [vmem:[#allocation6 + $0x18c] sm:$0xf0]  ;;  %v3203_v48 = vor.u32 %v3694_v43, %v3202_v40 }
 0x101   :  { %1879 = vmatpush.bf16.msra.mxu2 %v3159_v11  ;;  %1893 = vmatpush.bf16.msra.mxu3 %v3255_v12  ;;  %v3055_v11 = vor.u32 %v3656_v0, %v3052_v3  ;;  %v3199_v12 = vor.u32 %v3692_v4, %v3196_v5  ;;  %v3680_v56 = vld [vmem:[#allocation6 + $0x184] sm:$0xf]  ;;  %v3094_v0 = vld [vmem:[#allocation6 + $0x110] sm:$0xf]  ;;  %v3703_v3 = vld [vmem:[#allocation6 + $0x238] sm:$0xf0] }
 0x102   :  { %v3334_v4 = vld [vmem:[#allocation6 + $0x2f0] sm:$0xf]  ;;  %v3727_v5 = vld [vmem:[#allocation6 + $0x2f8] sm:$0xf0]  ;;  %v3151_v6 = vor.u32 %v3680_v56, %v3148_v54 }
 0x104   :  { %1904 = vmatpush.bf16.msrb.mxu0 %v3007_v17  ;;  %1918 = vmatpush.bf16.msrb.mxu1 %v3103_v14  ;;  %v3047_v17 = vor.u32 %v3655_v9, %v3046_v8  ;;  %v3143_v14 = vor.u32 %v3679_v57, %v3142_v55  ;;  %v2999_v8 = vor.u32 %v3643_v63, %v2998_v62  ;;  %v2986_v55 = vld [vmem:[#allocation6 + $0x38] sm:$0xf]  ;;  %v3640_v57 = vld [vmem:[#allocation6 + $0x40] sm:$0xf0] }
 0x105   :  { %1880 = vmatpush.bf16.msra.mxu2 %v3147_v28  ;;  %1894 = vmatpush.bf16.msra.mxu3 %v3243_v29  ;;  %v3035_v28 = vor.u32 %v3652_v21, %v3034_v20  ;;  %v3131_v29 = vor.u32 %v3676_v23, %v3130_v22  ;;  %v2987_v18 = vor.u32 %v3640_v57, %v2986_v55  ;;  %v2974_v20 = vld [vmem:[#allocation6 + $0x20] sm:$0xf]  ;;  %v3637_v21 = vld [vmem:[#allocation6 + $0x28] sm:$0xf0]  ;;  %v3706_v55 = vld [vmem:[#allocation6 + $0x250] sm:$0xf0] }
 0x106   :  { %v3227_v22 = vor.u32 %v3700_v13, %v3226_v16  ;;  %v3735_v57 = vld [vmem:[#allocation7 + $0x38] sm:$0xff] }
 0x108   :  { %1905 = vmatpush.bf16.msrb.mxu0 %v2995_v36  ;;  %1919 = vmatpush.bf16.msrb.mxu1 %v3091_v30  ;;  %v3710_v36 = vld [vmem:[#allocation6 + $0x274] sm:$0xf]  ;;  %v3268_v30 = vld [vmem:[#allocation6 + $0x27c] sm:$0xf0] }
 0x109   :  { %1929 = vmatpush.bf16.msrb.mxu2 %v3235_v33  ;;  %1943 = vmatpush.bf16.msrb.mxu3 %v3331_v34  ;;  %v3118_v33 = vld [vmem:[#allocation6 + $0x140] sm:$0xf]  ;;  %v3673_v34 = vld [vmem:[#allocation6 + $0x148] sm:$0xf0]  ;;  %v3271_v37 = vor.u32 %v3710_v36, %v3268_v30  ;;  %v2975_v36 = vor.u32 %v3637_v21, %v2974_v20 }
 0x10a   :  { %1881 = vmatmul.bf16.vlgmr.msra.gmra.mxu2 %v4082_v41  ;;  %1895 = vmatmul.bf16.vlgmr.msra.gmra.mxu3 %v4084_v42  ;;  %v3119_v45 = vor.u32 %v3673_v34, %v3118_v33  ;;  %v3215_v33 = vor.u32 %v3697_v27, %v3214_v26  ;;  %v3731_v26 = vld [vmem:[#allocation7 + $0x18] sm:$0xff] }
 0x10c   :  { %1906 = vmatpush.bf16.msrb.mxu0 %v2983_v46  ;;  %1920 = vmatpush.bf16.msrb.mxu1 %v3079_v47  ;;  %v3707_v46 = vld [vmem:[#allocation6 + $0x25c] sm:$0xf]  ;;  %v3256_v47 = vld [vmem:[#allocation6 + $0x264] sm:$0xf0] }
 0x10d   :  { %1930 = vmatpush.bf16.msrb.mxu2 %v3223_v50  ;;  %1944 = vmatpush.bf16.msrb.mxu3 %v3319_v51  ;;  %v3106_v50 = vld [vmem:[#allocation6 + $0x128] sm:$0xf]  ;;  %v3670_v51 = vld [vmem:[#allocation6 + $0x130] sm:$0xf0]  ;;  %v3259_v53 = vor.u32 %v3707_v46, %v3256_v47  ;;  %v2963_v46 = vor.u32 %v3634_v32, %v2962_v31 }
 0x10e   :  { %v3758_v32 = vld [vmem:[#allocation9 + $0x30] sm:$0xff] }
 0x110   :  { %1907 = vmatpush.bf16.msrb.mxu0 %v2971_v60  ;;  %1921 = vmatpush.bf16.msrb.mxu1 %v3067_v61  ;;  %v3107_v60 = vor.u32 %v3670_v51, %v3106_v50  ;;  %v3244_v61 = vld [vmem:[#allocation6 + $0x24c] sm:$0xf0]  ;;  %v3691_v51 = vld [vmem:[#allocation6 + $0x1d8] sm:$0xf0] }
 0x111   :  { %1931 = vmatpush.bf16.msrb.mxu2 %v3211_v1  ;;  %1945 = vmatpush.bf16.msrb.mxu3 %v3307_v2  ;;  %v3667_v1 = vld [vmem:[#allocation6 + $0x118] sm:$0xf0]  ;;  %v3238_v2 = vld [vmem:[#allocation6 + $0x230] sm:$0xf]  ;;  %v3247_v7 = vor.u32 %v3704_v58, %v3244_v61  ;;  %v3178_v58 = vld [vmem:[#allocation6 + $0x1b8] sm:$0xf] }
 0x112   :  { %v3095_v9 = vor.u32 %v3667_v1, %v3094_v0  ;;  %v3190_v50 = vld [vmem:[#allocation6 + $0x1d0] sm:$0xf]  ;;  %v3712_v61 = vld [vmem:[#allocation6 + $0x280] sm:$0xf0]  ;;  %v3166_v0 = vld [vmem:[#allocation6 + $0x1a0] sm:$0xf] }
 0x113   :  { %v3191_v56 = vor.u32 %v3691_v51, %v3190_v50  ;;  %v3685_v1 = vld [vmem:[#allocation6 + $0x1a8] sm:$0xf0] }
 0x114   :  { %1908 = vmatpush.bf16.msrb.mxu0 %v2959_v10  ;;  %1922 = vmatpush.bf16.msrb.mxu1 %v3055_v11  ;;  %v3239_v10 = vor.u32 %v3703_v3, %v3238_v2  ;;  %v3335_v11 = vor.u32 %v3727_v5, %v3334_v4  ;;  %v3262_v2 = vld [vmem:[#allocation6 + $0x260] sm:$0xf]  ;;  %v3709_v3 = vld [vmem:[#allocation6 + $0x268] sm:$0xf0]  ;;  %v3167_v4 = vor.u32 %v3685_v1, %v3166_v0 }
 0x115   :  { %1932 = vmatpush.bf16.msrb.mxu2 %v3199_v12  ;;  %1946 = vmatpush.bf16.msrb.mxu3 %v3295_v15  ;;  %v3082_v12 = vld [vmem:[#allocation6 + $0xf8] sm:$0xf]  ;;  %v3664_v15 = vld [vmem:[#allocation6 + $0x100] sm:$0xf0]  ;;  %v3263_v5 = vor.u32 %v3709_v3, %v3262_v2  ;;  %v3753_v2 = vld [vmem:[#allocation9 + $0x8] sm:$0xff] }
 0x116   :  { %v3083_v19 = vor.u32 %v3664_v15, %v3082_v12  ;;  %v3734_v15 = vld [vmem:[#allocation7 + $0x30] sm:$0xff] }
 0x117   :  { %1909 = vmatmul.bf16.vlgmr.msrb.gmra.mxu0 %v4074_v38  ;;  %1923 = vmatmul.bf16.vlgmr.msrb.gmra.mxu1 %v4076_v39 }
 0x118   :  { %1957 = vmatpush.bf16.msra.mxu0 %v3047_v17  ;;  %1971 = vmatpush.bf16.msra.mxu1 %v3143_v14  ;;  %v3322_v17 = vld [vmem:[#allocation6 + $0x2d8] sm:$0xf]  ;;  %v3724_v14 = vld [vmem:[#allocation6 + $0x2e0] sm:$0xf0] }
 0x119   :  { %1933 = vmatpush.bf16.msrb.mxu2 %v3187_v24  ;;  %1947 = vmatpush.bf16.msrb.mxu3 %v3283_v25  ;;  %v3323_v23 = vor.u32 %v3724_v14, %v3322_v17  ;;  %v3070_v24 = vld [vmem:[#allocation6 + $0xe0] sm:$0xf]  ;;  %v3661_v25 = vld [vmem:[#allocation6 + $0xe8] sm:$0xf0] }
 0x11a   :  { %v3071_v30 = vor.u32 %v3661_v25, %v3070_v24  ;;  %v3733_v17 = vld [vmem:[#allocation7 + $0x28] sm:$0xff] }
 0x11c   :  { %1958 = vmatpush.bf16.msra.mxu0 %v3035_v28  ;;  %1972 = vmatpush.bf16.msra.mxu1 %v3131_v29  ;;  %v3310_v28 = vld [vmem:[#allocation6 + $0x2c0] sm:$0xf]  ;;  %v3721_v29 = vld [vmem:[#allocation6 + $0x2c8] sm:$0xf0] }
 0x11d   :  { %1934 = vmatpush.bf16.msrb.mxu2 %v3175_v35  ;;  %1948 = vmatpush.bf16.msrb.mxu3 %v3271_v37  ;;  %v3311_v34 = vor.u32 %v3721_v29, %v3310_v28  ;;  %v3058_v35 = vld [vmem:[#allocation6 + $0xc8] sm:$0xf]  ;;  %v3658_v37 = vld [vmem:[#allocation6 + $0xd0] sm:$0xf0]  ;;  %v3759_v28 = vld [vmem:[#allocation9 + $0x38] sm:$0xff] }
 0x11e   :  { %v3059_v47 = vor.u32 %v3658_v37, %v3058_v35  ;;  %v3729_v35 = vld [vmem:[#allocation7 + $0x8] sm:$0xff] }
 0x120   :  { %1959 = vmatpush.bf16.msra.mxu0 %v3023_v44  ;;  %1973 = vmatpush.bf16.msra.mxu1 %v3119_v45  ;;  %v3298_v44 = vld [vmem:[#allocation6 + $0x2a8] sm:$0xf]  ;;  %v3718_v45 = vld [vmem:[#allocation6 + $0x2b0] sm:$0xf0] }
 0x121   :  { %1935 = vmatpush.bf16.msrb.mxu2 %v3163_v52  ;;  %1949 = vmatpush.bf16.msrb.mxu3 %v3259_v53  ;;  %v3299_v49 = vor.u32 %v3718_v45, %v3298_v44  ;;  %v3286_v52 = vld [vmem:[#allocation6 + $0x290] sm:$0xf]  ;;  %v3715_v53 = vld [vmem:[#allocation6 + $0x298] sm:$0xf0]  ;;  %v3757_v44 = vld [vmem:[#allocation9 + $0x28] sm:$0xff] }
 0x122   :  { %v3287_v54 = vor.u32 %v3715_v53, %v3286_v52  ;;  %v3728_v45 = vld [vmem:[#allocation7] sm:$0xff]  ;;  %v3755_v52 = vld [vmem:[#allocation9 + $0x18] sm:$0xff] }
 0x124   :  { %1960 = vmatpush.bf16.msra.mxu0 %v3011_v59  ;;  %1974 = vmatpush.bf16.msra.mxu1 %v3107_v60  ;;  %v3688_v59 = vld [vmem:[#allocation6 + $0x1c0] sm:$0xf0]  ;;  %v3274_v60 = vld [vmem:[#allocation6 + $0x278] sm:$0xf] }
 0x125   :  { %1936 = vmatpush.bf16.msrb.mxu2 %v3151_v6  ;;  %1950 = vmatpush.bf16.msrb.mxu3 %v3247_v7  ;;  %v3179_v62 = vor.u32 %v3688_v59, %v3178_v58  ;;  %v3275_v63 = vor.u32 %v3712_v61, %v3274_v60  ;;  %v3154_v6 = vld [vmem:[#allocation6 + $0x188] sm:$0xf]  ;;  %v3754_v60 = vld [vmem:[#allocation9 + $0x10] sm:$0xff] }
 0x128   :  { %1961 = vmatpush.bf16.msra.mxu0 %v2999_v8  ;;  %1975 = vmatpush.bf16.msra.mxu1 %v3095_v9  ;;  %v3682_v8 = vld [vmem:[#allocation6 + $0x190] sm:$0xf0]  ;;  %v3250_v9 = vld [vmem:[#allocation6 + $0x248] sm:$0xf] }
 0x129   :  { %1985 = vmatpush.bf16.msra.mxu2 %v3239_v10  ;;  %1999 = vmatpush.bf16.msra.mxu3 %v3335_v11  ;;  %v4097_v10 = vld [vmem:[%s4167_s4] sm:$0x7] }
 0x12a   :  { %1937 = vmatmul.bf16.vlgmr.msrb.gmra.mxu2 %v4082_v41  ;;  %1951 = vmatmul.bf16.vlgmr.msrb.gmra.mxu3 %v4084_v42  ;;  %v505_v12 = vperm.slane %v4097_v10, 0  ;;  %v506_v29 = vperm.slane %v4097_v10, 1 }
 0x12c   :  { %1962 = vmatpush.bf16.msra.mxu0 %v2987_v18  ;;  %1976 = vmatpush.bf16.msra.mxu1 %v3083_v19  ;;  %v3732_v19 = vld [vmem:[#allocation7 + $0x20] sm:$0xff] }
 0x12d   :  { %1986 = vmatpush.bf16.msra.mxu2 %v3227_v22  ;;  %2000 = vmatpush.bf16.msra.mxu3 %v3323_v23 }
 0x130   :  { %1963 = vmatpush.bf16.msra.mxu0 %v2975_v36  ;;  %1977 = vmatpush.bf16.msra.mxu1 %v3071_v30 }
 0x131   :  { %1987 = vmatpush.bf16.msra.mxu2 %v3215_v33  ;;  %2001 = vmatpush.bf16.msra.mxu3 %v3311_v34 }
 0x133   :  { %v1032_v7 = vpop.f32.mrf.mxu0  ;;  %v1046_v11 = vpop.f32.mrf.mxu1 }
 0x134   :  { %1964 = vmatpush.bf16.msra.mxu0 %v2963_v46  ;;  %1978 = vmatpush.bf16.msra.mxu1 %v3059_v47  ;;  %v1033_v13 = vadd.f32 %v1032_v7, %v505_v12 }
 0x135   :  { %1988 = vmatpush.bf16.msra.mxu2 %v3203_v48  ;;  %2002 = vmatpush.bf16.msra.mxu3 %v3299_v49  ;;  %v3756_v49 = vld [vmem:[#allocation9 + $0x20] sm:$0xff] }
 0x136   :  { %v1047_v14 = vadd.f32 %v1046_v11, %v1033_v13  ;;  %v3742_v13 = vld [vmem:[#allocation7 + $0x70] sm:$0xff] }
 0x137   :  { %1965 = vmatmul.bf16.vlgmr.msra.gmra.mxu0 %v4074_v38  ;;  %1979 = vmatmul.bf16.vlgmr.msra.gmra.mxu1 %v4076_v39  ;;  %v3155_v38 = vor.u32 %v3682_v8, %v3154_v6  ;;  %v3251_v39 = vor.u32 %v3706_v55, %v3250_v9  ;;  %v3752_v55 = vld [vmem:[#allocation9] sm:$0xff] }
 0x138   :  { %2265 = vmatpush.bf16.msrb.mxu0 %v3759_v28 }
 0x139   :  { %1989 = vmatpush.bf16.msra.mxu2 %v3191_v56  ;;  %2003 = vmatpush.bf16.msra.mxu3 %v3287_v54 }
 0x13b   :  { %v1034_v16 = vpop.f32.mrf.mxu0  ;;  %v1048_v18 = vpop.f32.mrf.mxu1 }
 0x13c   :  { %v1035_v23 = vadd.f32 %v1034_v16, %v505_v12  ;;  %2266 = vmatpush.bf16.msrb.mxu0 %v3758_v32  ;;  %v3766_v16 = vld [vmem:[#allocation9 + $0x70] sm:$0xff] }
 0x13d   :  { %1990 = vmatpush.bf16.msra.mxu2 %v3179_v62  ;;  %2004 = vmatpush.bf16.msra.mxu3 %v3275_v63  ;;  %v507_v62 = vperm.slane %v4097_v10, 2  ;;  %v3743_v10 = vld [vmem:[#allocation7 + $0x78] sm:$0xff] }
 0x140   :  { %2267 = vmatpush.bf16.msrb.mxu0 %v3757_v44  ;;  %v3736_v44 = vld [vmem:[#allocation7 + $0x40] sm:$0xff] }
 0x141   :  { %1991 = vmatpush.bf16.msra.mxu2 %v3167_v4  ;;  %2005 = vmatpush.bf16.msra.mxu3 %v3263_v5 }
 0x144   :  { %v1088_v24 = vpop.f32.mrf.mxu0  ;;  %v1102_v33 = vpop.f32.mrf.mxu1  ;;  %2268 = vmatpush.bf16.msrb.mxu0 %v3756_v49 }
 0x145   :  { %1992 = vmatpush.bf16.msra.mxu2 %v3155_v38  ;;  %2006 = vmatpush.bf16.msra.mxu3 %v3251_v39  ;;  %v1089_v37 = vadd.f32 %v1088_v24, %v506_v29 }
 0x147   :  { %v1103_v46 = vadd.f32 %v1102_v33, %v1089_v37  ;;  %v3761_v33 = vld [vmem:[#allocation9 + $0x48] sm:$0xff] }
 0x148   :  { %1993 = vmatmul.bf16.vlgmr.msra.gmra.mxu2 %v4082_v41  ;;  %2007 = vmatmul.bf16.vlgmr.msra.gmra.mxu3 %v4084_v42  ;;  %v1049_v41 = vadd.f32 %v1048_v18, %v1035_v23  ;;  %v3730_v42 = vld [vmem:[#allocation7 + $0x10] sm:$0xff] }
 0x149   :  { %2451 = vmatpush.bf16.msrb.mxu3 %v3735_v57  ;;  %v1060_v20 = vpop.f32.mrf.mxu2  ;;  %v1074_v21 = vpop.f32.mrf.mxu3  ;;  %2269 = vmatpush.bf16.msrb.mxu0 %v3755_v52  ;;  %v3767_v57 = vld [vmem:[#allocation9 + $0x78] sm:$0xff]  ;;  %v3750_v52 = vld [vmem:[#allocation7 + $0xb0] sm:$0xff] }
 0x14a   :  { %v1061_v22 = vadd.f32 %v1060_v20, %v1047_v14  ;;  %2279 = vmatpush.bf16.msrb.mxu1 %v3767_v57  ;;  %v3765_v20 = vld [vmem:[#allocation9 + $0x68] sm:$0xff] }
 0x14c   :  { %v1075_v25 = vadd.f32 %v1074_v21, %v1061_v22  ;;  %v1090_v40 = vpop.f32.mrf.mxu0  ;;  %v1104_v56 = vpop.f32.mrf.mxu1  ;;  %v3741_v21 = vld [vmem:[#allocation7 + $0x68] sm:$0xff] }
 0x14d   :  { %2452 = vmatpush.bf16.msrb.mxu3 %v3734_v15  ;;  %v1091_v53 = vadd.f32 %v1090_v40, %v506_v29  ;;  %2270 = vmatpush.bf16.msrb.mxu0 %v3754_v60  ;;  %v3739_v29 = vld [vmem:[#allocation7 + $0x58] sm:$0xff] }
 0x14e   :  { %v1191_v27 = vmax.f32 %v1075_v25, 0.0  ;;  %2280 = vmatpush.bf16.msrb.mxu1 %v3766_v16  ;;  %v3764_v25 = vld [vmem:[#allocation9 + $0x60] sm:$0xff] }
 0x14f   :  { %v1105_v61 = vadd.f32 %v1104_v56, %v1091_v53 }
 0x150   :  { %2501 = vst [vmem:[%s4174_s11] sm:$0xff] %v1191_v27 }
 0x151   :  { %2453 = vmatpush.bf16.msrb.mxu3 %v3733_v17  ;;  %v1062_v36 = vpop.f32.mrf.mxu2  ;;  %v1076_v30 = vpop.f32.mrf.mxu3  ;;  %2271 = vmatpush.bf16.msrb.mxu0 %v3753_v2 }
 0x152   :  { %v1063_v31 = vadd.f32 %v1062_v36, %v1049_v41  ;;  %2281 = vmatpush.bf16.msrb.mxu1 %v3765_v20  ;;  %v4129_v41 = vld [vmem:[%s4169_s6] sm:$0x7]  ;;  %v3762_v36 = vld [vmem:[#allocation9 + $0x50] sm:$0xff] }
 0x154   :  { %v1077_v34 = vadd.f32 %v1076_v30, %v1063_v31  ;;  %v1144_v59 = vpop.f32.mrf.mxu0  ;;  %v1158_v5 = vpop.f32.mrf.mxu1  ;;  %v3738_v30 = vld [vmem:[#allocation7 + $0x50] sm:$0xff]  ;;  %v1327_v31 = vperm.slane %v4129_v41, 0 }
 0x155   :  { %2454 = vmatpush.bf16.msrb.mxu3 %v3732_v19  ;;  %v1145_v4 = vadd.f32 %v1144_v59, %v507_v62  ;;  %2272 = vmatpush.bf16.msrb.mxu0 %v3752_v55  ;;  %v3745_v55 = vld [vmem:[#allocation7 + $0x88] sm:$0xff] }
 0x156   :  { %v1194_v43 = vmax.f32 %v1077_v34, 0.0  ;;  %2282 = vmatpush.bf16.msrb.mxu1 %v3764_v25  ;;  %v3737_v34 = vld [vmem:[#allocation7 + $0x48] sm:$0xff] }
 0x157   :  { %v1159_v8 = vadd.f32 %v1158_v5, %v1145_v4  ;;  %v3774_v4 = vld [vmem:[#allocation9 + $0xb0] sm:$0xff] }
 0x158   :  { %2504 = vst [vmem:[%s4174_s11 + $0x18] sm:$0xff] %v1194_v43  ;;  %v2019_v50 = vpack.c.bf16 %v1194_v43, %v1191_v27  ;;  %v3760_v43 = vld [vmem:[#allocation9 + $0x40] sm:$0xff]  ;;  %v3746_v5 = vld [vmem:[#allocation7 + $0x90] sm:$0xff] }
 0x159   :  { %2455 = vmatpush.bf16.msrb.mxu3 %v3731_v26  ;;  %v1116_v47 = vpop.f32.mrf.mxu2  ;;  %v1130_v48 = vpop.f32.mrf.mxu3  ;;  %2465 = vmatpush.bf16.msra.mxu0 %v3743_v10  ;;  %v3740_v26 = vld [vmem:[#allocation7 + $0x60] sm:$0xff] }
 0x15a   :  { %v1117_v51 = vadd.f32 %v1116_v47, %v1103_v46  ;;  %v3751_v46 = vld [vmem:[#allocation7 + $0xb8] sm:$0xff]  ;;  %v3744_v10 = vld [vmem:[#allocation7 + $0x80] sm:$0xff] }
 0x15c   :  { %v1131_v54 = vadd.f32 %v1130_v48, %v1117_v51  ;;  %v1146_v9 = vpop.f32.mrf.mxu0  ;;  %v1160_v14 = vpop.f32.mrf.mxu1 }
 0x15d   :  { %2456 = vmatpush.bf16.msrb.mxu3 %v3730_v42  ;;  %v1147_v12 = vadd.f32 %v1146_v9, %v507_v62  ;;  %2466 = vmatpush.bf16.msra.mxu0 %v3742_v13  ;;  %v3763_v42 = vld [vmem:[#allocation9 + $0x58] sm:$0xff]  ;;  %v1328_v9 = vperm.slane %v4129_v41, 1 }
 0x15e   :  { %v1192_v58 = vmax.f32 %v1131_v54, 0.0  ;;  %2283 = vmatpush.bf16.msrb.mxu1 %v3763_v42 }
 0x15f   :  { %v1161_v18 = vadd.f32 %v1160_v14, %v1147_v12  ;;  %v3770_v14 = vld [vmem:[#allocation9 + $0x90] sm:$0xff] }
 0x160   :  { %2502 = vst [vmem:[%s4174_s11 + $0x8] sm:$0xff] %v1192_v58 }
 0x161   :  { %2457 = vmatpush.bf16.msrb.mxu3 %v3729_v35  ;;  %v1118_v63 = vpop.f32.mrf.mxu2  ;;  %v1132_v0 = vpop.f32.mrf.mxu3  ;;  %2467 = vmatpush.bf16.msra.mxu0 %v3741_v21 }
 0x162   :  { %v1119_v1 = vadd.f32 %v1118_v63, %v1105_v61  ;;  %2284 = vmatpush.bf16.msrb.mxu1 %v3762_v36  ;;  %v3748_v63 = vld [vmem:[#allocation7 + $0xa0] sm:$0xff] }
 0x164   :  { %v1133_v3 = vadd.f32 %v1132_v0, %v1119_v1  ;;  %v3775_v0 = vld [vmem:[#allocation9 + $0xb8] sm:$0xff] }
 0x165   :  { %2458 = vmatpush.bf16.msrb.mxu3 %v3728_v45  ;;  %2468 = vmatpush.bf16.msra.mxu0 %v3740_v26 }
 0x166   :  { %v1195_v6 = vmax.f32 %v1133_v3, 0.0  ;;  %2285 = vmatpush.bf16.msrb.mxu1 %v3761_v33  ;;  %2293 = vmatpush.bf16.msrb.mxu2 %v3775_v0  ;;  %v3747_v3 = vld [vmem:[#allocation7 + $0x98] sm:$0xff] }
 0x168   :  { %2459 = vmatmul.bf16.vlgmr.msrb.gmra.mxu3 %v2019_v50  ;;  %v4113_v7 = vpack.c.bf16 %v1195_v6, %v1192_v58  ;;  %2505 = vst [vmem:[%s4174_s11 + $0x20] sm:$0xff] %v1195_v6  ;;  %v3749_v58 = vld [vmem:[#allocation7 + $0xa8] sm:$0xff] }
 0x169   :  { %2469 = vmatpush.bf16.msra.mxu0 %v3739_v29  ;;  %v3773_v6 = vld [vmem:[#allocation9 + $0xa8] sm:$0xff] }
 0x16a   :  { %2286 = vmatpush.bf16.msrb.mxu1 %v3760_v43  ;;  %2294 = vmatpush.bf16.msrb.mxu2 %v3774_v4 }
 0x16d   :  { %v1172_v38 = vpop.f32.mrf.mxu2  ;;  %v1186_v39 = vpop.f32.mrf.mxu3  ;;  %2470 = vmatpush.bf16.msra.mxu0 %v3738_v30  ;;  %v1329_v30 = vperm.slane %v4129_v41, 2 }
 0x16e   :  { %v1173_v11 = vadd.f32 %v1172_v38, %v1159_v8  ;;  %2479 = vmatpush.bf16.msra.mxu1 %v3751_v46  ;;  %2295 = vmatpush.bf16.msrb.mxu2 %v3773_v6  ;;  %v3772_v38 = vld [vmem:[#allocation9 + $0xa0] sm:$0xff] }
 0x170   :  { %v1187_v15 = vadd.f32 %v1186_v39, %v1173_v11  ;;  %v3771_v11 = vld [vmem:[#allocation9 + $0x98] sm:$0xff] }
 0x171   :  { %2471 = vmatpush.bf16.msra.mxu0 %v3737_v34 }
 0x172   :  { %v1193_v17 = vmax.f32 %v1187_v15, 0.0  ;;  %2480 = vmatpush.bf16.msra.mxu1 %v3750_v52  ;;  %2296 = vmatpush.bf16.msrb.mxu2 %v3772_v38 }
 0x174   :  { %2503 = vst [vmem:[%s4174_s11 + $0x10] sm:$0xff] %v1193_v17  ;;  %v1854_v32 = vpop.f32.mrf.mxu0  ;;  %v1868_v37 = vpop.f32.mrf.mxu1 }
 0x175   :  { %v1174_v19 = vpop.f32.mrf.mxu2  ;;  %v1188_v23 = vpop.f32.mrf.mxu3  ;;  %v1855_v35 = vadd.f32 %v1854_v32, %v1327_v31  ;;  %2472 = vmatpush.bf16.msra.mxu0 %v3736_v44 }
 0x176   :  { %v1175_v22 = vadd.f32 %v1174_v19, %v1161_v18  ;;  %2481 = vmatpush.bf16.msra.mxu1 %v3749_v58  ;;  %2297 = vmatpush.bf16.msrb.mxu2 %v3771_v11 }
 0x177   :  { %v1869_v40 = vadd.f32 %v1868_v37, %v1855_v35 }
 0x178   :  { %v1189_v24 = vadd.f32 %v1188_v23, %v1175_v22  ;;  %v3769_v22 = vld [vmem:[#allocation9 + $0x88] sm:$0xff] }
 0x17a   :  { %v1196_v27 = vmax.f32 %v1189_v24, 0.0  ;;  %2482 = vmatpush.bf16.msra.mxu1 %v3748_v63  ;;  %2298 = vmatpush.bf16.msrb.mxu2 %v3770_v14 }
 0x17c   :  { %v4121_v28 = vpack.c.bf16 %v1196_v27, %v1193_v17  ;;  %2506 = vst [vmem:[%s4174_s11 + $0x28] sm:$0xff] %v1196_v27  ;;  %v1856_v45 = vpop.f32.mrf.mxu0  ;;  %v1870_v53 = vpop.f32.mrf.mxu1  ;;  %v3768_v27 = vld [vmem:[#allocation9 + $0x80] sm:$0xff] }
 0x17d   :  { %v1857_v49 = vadd.f32 %v1856_v45, %v1327_v31 }
 0x17e   :  { %2483 = vmatpush.bf16.msra.mxu1 %v3747_v3  ;;  %2299 = vmatpush.bf16.msrb.mxu2 %v3769_v22 }
 0x17f   :  { %v1871_v56 = vadd.f32 %v1870_v53, %v1857_v49 }
 0x182   :  { %2484 = vmatpush.bf16.msra.mxu1 %v3746_v5  ;;  %2300 = vmatpush.bf16.msrb.mxu2 %v3768_v27 }
 0x186   :  { %2485 = vmatpush.bf16.msra.mxu1 %v3745_v55 }
 0x18a   :  { %2486 = vmatpush.bf16.msra.mxu1 %v3744_v10 }
 0x18d   :  { %v1882_v47 = vpop.f32.mrf.mxu2  ;;  %v1896_v48 = vpop.f32.mrf.mxu3 }
 0x18e   :  { %v1883_v50 = vadd.f32 %v1882_v47, %v1869_v40 }
 0x190   :  { %v1897_v51 = vadd.f32 %v1896_v48, %v1883_v50 }
 0x192   :  { %v2013_v54 = vmax.f32 %v1897_v51, 0.0 }
 0x194   :  { %2507 = vst [vmem:[%s4175_s12] sm:$0xff] %v2013_v54  ;;  %v1910_v8 = vpop.f32.mrf.mxu0  ;;  %v1924_v39 = vpop.f32.mrf.mxu1 }
 0x195   :  { %v1884_v59 = vpop.f32.mrf.mxu2  ;;  %v1898_v60 = vpop.f32.mrf.mxu3  ;;  %v1911_v57 = vadd.f32 %v1910_v8, %v1328_v9 }
 0x196   :  { %v1885_v61 = vadd.f32 %v1884_v59, %v1871_v56 }
 0x197   :  { %v1925_v12 = vadd.f32 %v1924_v39, %v1911_v57 }
 0x198   :  { %v1899_v62 = vadd.f32 %v1898_v60, %v1885_v61 }
 0x19a   :  { %v2016_v1 = vmax.f32 %v1899_v62, 0.0 }
 0x19c   :  { %v2070_v2 = vpack.c.bf16 %v2016_v1, %v2013_v54  ;;  %2510 = vst [vmem:[%s4175_s12 + $0x18] sm:$0xff] %v2016_v1  ;;  %v1912_v15 = vpop.f32.mrf.mxu0  ;;  %v1926_v20 = vpop.f32.mrf.mxu1 }
 0x19d   :  { %v1913_v18 = vadd.f32 %v1912_v15, %v1328_v9 }
 0x19e   :  { %2273 = vmatmul.bf16.vlgmr.msrb.gmra.mxu0 %v2070_v2  ;;  %v3787_v2 = vld [vmem:[%s4172_s9] ss:$0 sm:$0xff] }
 0x19f   :  { %v1927_v23 = vadd.f32 %v1926_v20, %v1913_v18 }
 0x1ad   :  { %v1938_v16 = vpop.f32.mrf.mxu2  ;;  %v1952_v13 = vpop.f32.mrf.mxu3 }
 0x1ae   :  { %v1939_v17 = vadd.f32 %v1938_v16, %v1925_v12  ;;  %2473 = vmatmul.bf16.vlgmr.msra.gmra.mxu0 %v4113_v7 }
 0x1b0   :  { %v1953_v19 = vadd.f32 %v1952_v13, %v1939_v17 }
 0x1b2   :  { %v2014_v21 = vmax.f32 %v1953_v19, 0.0 }
 0x1b4   :  { %2508 = vst [vmem:[%s4175_s12 + $0x8] sm:$0xff] %v2014_v21  ;;  %v1966_v7 = vpop.f32.mrf.mxu0  ;;  %v1980_v32 = vpop.f32.mrf.mxu1 }
 0x1b5   :  { %v1940_v24 = vpop.f32.mrf.mxu2  ;;  %v1954_v26 = vpop.f32.mrf.mxu3  ;;  %v1967_v31 = vadd.f32 %v1966_v7, %v1329_v30 }
 0x1b6   :  { %v1941_v25 = vadd.f32 %v1940_v24, %v1927_v23 }
 0x1b7   :  { %v1981_v33 = vadd.f32 %v1980_v32, %v1967_v31 }
 0x1b8   :  { %v1955_v42 = vadd.f32 %v1954_v26, %v1941_v25 }
 0x1ba   :  { %v2017_v29 = vmax.f32 %v1955_v42, 0.0 }
 0x1bc   :  { %v2071_v36 = vpack.c.bf16 %v2017_v29, %v2014_v21  ;;  %2511 = vst [vmem:[%s4175_s12 + $0x20] sm:$0xff] %v2017_v29  ;;  %v1968_v34 = vpop.f32.mrf.mxu0  ;;  %v1982_v46 = vpop.f32.mrf.mxu1 }
 0x1bd   :  { %v1969_v43 = vadd.f32 %v1968_v34, %v1329_v30 }
 0x1be   :  { %2287 = vmatmul.bf16.vlgmr.msrb.gmra.mxu1 %v2071_v36 }
 0x1bf   :  { %v1983_v47 = vadd.f32 %v1982_v46, %v1969_v43 }
 0x1cb   :  { %v1994_v35 = vpop.f32.mrf.mxu2  ;;  %v2008_v37 = vpop.f32.mrf.mxu3 }
 0x1cc   :  { %v1995_v40 = vadd.f32 %v1994_v35, %v1981_v33 }
 0x1ce   :  { %v2009_v44 = vadd.f32 %v2008_v37, %v1995_v40  ;;  %2487 = vmatmul.bf16.vlgmr.msra.gmra.mxu1 %v4121_v28 }
 0x1d0   :  { %v2015_v45 = vmax.f32 %v2009_v44, 0.0 }
 0x1d2   :  { %2509 = vst [vmem:[%s4175_s12 + $0x10] sm:$0xff] %v2015_v45 }
 0x1d3   :  { %v1996_v48 = vpop.f32.mrf.mxu2  ;;  %v2010_v49 = vpop.f32.mrf.mxu3 }
 0x1d4   :  { %v1997_v41 = vadd.f32 %v1996_v48, %v1983_v47 }
 0x1d6   :  { %v2011_v50 = vadd.f32 %v2010_v49, %v1997_v41 }
 0x1d8   :  { %v2018_v51 = vmax.f32 %v2011_v50, 0.0 }
 0x1da   :  { %v2072_v52 = vpack.c.bf16 %v2018_v51, %v2015_v45  ;;  %2512 = vst [vmem:[%s4175_s12 + $0x28] sm:$0xff] %v2018_v51 }
 0x1dc   :  { %2301 = vmatmul.bf16.vlgmr.msrb.gmra.mxu2 %v2072_v52 }
 0x1eb   :  { %v2460_v59 = vpop.f32.mrf.mxu3 }
 0x1f3   :  { %v2462_v9 = vpop.f32.mrf.mxu3 }
 0x21b   :  { %v2274_v53 = vpop.f32.mrf.mxu0 }
 0x223   :  { %v2276_v56 = vpop.f32.mrf.mxu0 }
 0x22b   :  { %v2474_v62 = vpop.f32.mrf.mxu0 }
 0x233   :  { %v2476_v38 = vpop.f32.mrf.mxu0 }
 0x23b   :  { %v2288_v28 = vpop.f32.mrf.mxu1 }
 0x23c   :  { %v2289_v58 = vadd.f32 %v2288_v28, %v2274_v53 }
 0x243   :  { %v2290_v54 = vpop.f32.mrf.mxu1 }
 0x244   :  { %v2291_v3 = vadd.f32 %v2290_v54, %v2276_v56 }
 0x24b   :  { %v2488_v0 = vpop.f32.mrf.mxu1 }
 0x253   :  { %v2490_v57 = vpop.f32.mrf.mxu1 }
 0x25f   :  { %v2302_v60 = vpop.f32.mrf.mxu2 }
 0x260   :  { %v2303_v61 = vadd.f32 %v2302_v60, %v2289_v58 }
 0x262   :  { %v2461_v63 = vadd.f32 %v2460_v59, %v2303_v61 }
 0x264   :  { %v2475_v1 = vadd.f32 %v2474_v62, %v2461_v63 }
 0x266   :  { %v2489_v4 = vadd.f32 %v2488_v0, %v2475_v1 }
 0x267   :  { %v2304_v5 = vpop.f32.mrf.mxu2 }
 0x268   :  { %v2497_v6 = vadd.f32 %v3787_v2, %v2489_v4  ;;  %v2305_v8 = vadd.f32 %v2304_v5, %v2291_v3 }
 0x26a   :  { %2499 = vst [vmem:[%s4173_s10] sm:$0xff] %v2497_v6  ;;  %v2463_v55 = vadd.f32 %v2462_v9, %v2305_v8 }
 0x26c   :  { %v2477_v39 = vadd.f32 %v2476_v38, %v2463_v55 }
 0x26e   :  { %v2491_v10 = vadd.f32 %v2490_v57, %v2477_v39 }
 0x270   :  { %v2498_v11 = vadd.f32 %v3787_v2, %v2491_v10 }
 0x272   :  { %2500 = vst [vmem:[%s4173_s10 + $0x8] sm:$0xff] %v2498_v11 }
 0x273   :  { %2525 = vsyncpa [#allocation3], 1 }
 0x274   :  { %2526 = vsyncpa [#allocation5], 1 }
 0x275   :  { %2527 = vsyncpa [#allocation8], 1 }

</bundles_post_ra>
